<compile_context>
chip_gen: v7x
topology: tpu7x:2x2x1
jax: 0.10.0
libtpu: 0.0.40
codegen_flags: <defaults>
</compile_context>

<pallas_src>
import math
import jax
import jax.numpy as jnp
from jax.experimental import pallas as pl
from jax.experimental.pallas import tpu as pltpu

HIDDEN = 32          # hidden_size (must be divisible by 8 heads)
NUM_SCALES = 3       # num_scales
NUM_HEADS = 8        # fixed by the module
HEAD_DIM = HIDDEN // NUM_HEADS
BATCH = 2
SEQ = 8              # per-scale sequence length (must match across scales for
                     # the final cat(dim=-1) to be valid)


# ----------------------------------------------------------------------------
# Fused Pallas kernel
# ----------------------------------------------------------------------------
def _cross_scale_kernel(x_ref, wqkv_ref, bqkv_ref, hmask_ref, kbias_ref,
                        wof_ref, bf_ref, o_ref):
    """Fully fused CrossScaleAttention forward for the whole batch.

    x_ref    : (B, NS*S, H)     all scale activations concatenated along seq
    wqkv_ref : (H, 3H)          packed [Wq/sqrt(hd) | Wk | Wv]
    bqkv_ref : (1, 3H)          packed [bq/sqrt(hd) | bk | bv]
    hmask_ref: (NH, H)          0/1 per-head lane mask
    kbias_ref: (NS*NH*S, NS*S)  -1e30 on keys of the query's own scale, else 0
    wof_ref  : (NS, H, H)       wo @ wf_block_i  (out-proj folded into fusion)
    bf_ref   : (1, H)           bf + bo @ sum_i wf_block_i
    o_ref    : (B, S, H)
    """
    B, T, H = x_ref.shape
    NH = hmask_ref.shape[0]
    NS = wof_ref.shape[0]
    S = T // NS
    M = NS * NH * S

    # --- packed QKV projection: one 2-D matmul for all scales & batches ------
    x2d = x_ref[...].reshape(B * T, H)                              # (48, 32)
    qkv = jnp.dot(x2d, wqkv_ref[...],
                  preferred_element_type=jnp.float32) + bqkv_ref[...]
    q = qkv[:, :H].reshape(B, NS, 1, S, H)        # already scaled by 1/sqrt(hd)
    k = qkv[:, H:2 * H].reshape(B, T, H)
    v = qkv[:, 2 * H:].reshape(B, T, H)

    hmask = hmask_ref[...]                                           # (NH, H)

    # --- per-head scores via head-masked Q; (scale, head, query) stacked in M
    qm = (q * hmask.reshape(1, 1, NH, 1, H)).reshape(B, M, H)        # (B,192,32)
    s = jnp.einsum('bmh,bkh->bmk', qm, k,
                   preferred_element_type=jnp.float32)               # (B,192,24)
    s = s + kbias_ref[...][None]                  # mask keys of the own scale

    # --- softmax over keys (exact division; at least one key is unmasked) ----
    s = s - jnp.max(s, axis=-1, keepdims=True)
    p = jnp.exp(s)
    p = p / jnp.sum(p, axis=-1, keepdims=True)

    # --- attention values ----------------------------------------------------
    oh = jnp.einsum('bmk,bkh->bmh', p, v,
                    preferred_element_type=jnp.float32)              # (B,192,32)

    # --- recombine heads (keep each head's own lanes, sum over head axis) ----
    attn = jnp.sum(oh.reshape(B, NS, NH, S, H) * hmask.reshape(1, 1, NH, 1, H),
                   axis=2)                                           # (B,NS,S,H)

    # --- fused out-proj + fusion Linear: sum_i attn_i @ (wo @ wf_i) + b' -----
    wof = wof_ref[...]                                               # (NS,H,H)
    acc = jnp.zeros((B * S, H), jnp.float32)
    for i in range(NS):                                              # static unroll
        acc = acc + jnp.dot(attn[:, i].reshape(B * S, H), wof[i],
                            preferred_element_type=jnp.float32)
    fused = acc + bf_ref[...]
    o_ref[...] = fused.reshape(B, S, H).astype(o_ref.dtype)


# ----------------------------------------------------------------------------
# Wrapper (operand packing + pallas_call)
# ----------------------------------------------------------------------------
def _pack_operands(scale_outputs, params):
    B, S, H = scale_outputs[0].shape
    assert all(s.shape == (B, S, H) for s in scale_outputs), \
        "all scales must share the same (B, S, H)"
    ns = len(scale_outputs)
    nh = NUM_HEADS
    hd = H // nh
    sm = 1.0 / math.sqrt(hd)
    hp = jax.lax.Precision.HIGHEST

    x_all = jnp.concatenate(scale_outputs, axis=1)                  # (B, ns*S, H)
    w_qkv = jnp.concatenate(
        [params["wq"] * sm, params["wk"], params["wv"]], axis=1)    # (H, 3H)
    b_qkv = jnp.concatenate(
        [params["bq"] * sm, params["bk"], params["bv"]], axis=1)    # (1, 3H)

    # 0/1 per-head lane mask.
    head_of_lane = jnp.arange(H, dtype=jnp.int32) // hd
    hmask = (head_of_lane[None, :] ==
             jnp.arange(nh, dtype=jnp.int32)[:, None]).astype(jnp.float32)  # (nh,H)

    # -1e30 bias on keys belonging to the query's own scale.
    T = ns * S
    M = ns * nh * S
    row_scale = jnp.arange(M, dtype=jnp.int32) // (nh * S)
    key_scale = jnp.arange(T, dtype=jnp.int32) // S
    kbias = jnp.where(row_scale[:, None] == key_scale[None, :],
                      jnp.float32(-1e30), jnp.float32(0.0))          # (M, T)

    # Fold the attention output projection into the fusion Linear (exact).
    wf_blocks = params["wf"].reshape(ns, H, H)                       # wf[i*H:(i+1)*H]
    wof = jnp.einsum('hk,iko->iho', params["wo"], wf_blocks, precision=hp)
    bfused = params["bf"] + jnp.dot(params["bo"], wf_blocks.sum(axis=0),
                                    precision=hp)                    # (1, H)

    return x_all, w_qkv, b_qkv, hmask, kbias, wof, bfused


def cross_scale_attention(scale_outputs, params):
    """Pallas implementation of CrossScaleAttention.forward (eval mode)."""
    B, S, H = scale_outputs[0].shape
    operands = _pack_operands(scale_outputs, params)

    vmem = pltpu.MemorySpace.VMEM
    return pl.pallas_call(
        _cross_scale_kernel,
        out_shape=jax.ShapeDtypeStruct((B, S, H), scale_outputs[0].dtype),
        in_specs=[pl.BlockSpec(memory_space=vmem) for _ in range(len(operands))],
        out_specs=pl.BlockSpec(memory_space=vmem),
    )(*operands)


# ----------------------------------------------------------------------------
# Pure-JAX reference (correctness check only)
# ----------------------------------------------------------------------------
def _mha_ref(q_in, kv_in, p):
    hp = jax.lax.Precision.HIGHEST
    q = q_in @ p["wq"] + p["bq"]
    k = kv_in @ p["wk"] + p["bk"]
    v = kv_in @ p["wv"] + p["bv"]
    B, S, H = q.shape
    So = k.shape[1]
    qh = q.reshape(B, S, NUM_HEADS, HEAD_DIM).transpose(0, 2, 1, 3)
    kh = k.reshape(B, So, NUM_HEADS, HEAD_DIM).transpose(0, 2, 1, 3)
    vh = v.reshape(B, So, NUM_HEADS, HEAD_DIM).transpose(0, 2, 1, 3)
    s = jnp.einsum("bnqd,bnkd->bnqk", qh, kh, precision=hp) / math.sqrt(HEAD_DIM)
    pw = jax.nn.softmax(s, axis=-1)
    o = jnp.einsum("bnqk,bnkd->bnqd", pw, vh, precision=hp)
    o = o.transpose(0, 2, 1, 3).reshape(B, S, H)
    return o @ p["wo"] + p["bo"]


def _reference(scale_outputs, p):
    outs = []
    for i, so in enumerate(scale_outputs):
        others = jnp.concatenate(
            [s for j, s in enumerate(scale_outputs) if j != i], axis=1)
        outs.append(_mha_ref(so, others, p))
    combined = jnp.concatenate(outs, axis=-1)
    return combined @ p["wf"] + p["bf"]


# ----------------------------------------------------------------------------
# Deterministic parameter init + run
# ----------------------------------------------------------------------------
def init_params(key):
    ks = jax.random.split(key, 10)
    H, HN = HIDDEN, HIDDEN * NUM_SCALES
    scale = 0.1
    return {
        "wq": scale * jax.random.normal(ks[0], (H, H), jnp.float32),
        "wk": scale * jax.random.normal(ks[1], (H, H), jnp.float32),
        "wv": scale * jax.random.normal(ks[2], (H, H), jnp.float32),
        "bq": scale * jax.random.normal(ks[3], (1, H), jnp.float32),
        "bk": scale * jax.random.normal(ks[4], (1, H), jnp.float32),
        "bv": scale * jax.random.normal(ks[5], (1, H), jnp.float32),
        "wo": scale * jax.random.normal(ks[6], (H, H), jnp.float32),
        "bo": scale * jax.random.normal(ks[7], (1, H), jnp.float32),
        "wf": scale * jax.random.normal(ks[8], (HN, H), jnp.float32),
        "bf": scale * jax.random.normal(ks[9], (1, H), jnp.float32),
    }


if __name__ == "__main__":
    root = jax.random.PRNGKey(0)
    pkey, *xkeys = jax.random.split(root, 1 + NUM_SCALES)

    params = init_params(pkey)
    scale_outputs = [
        jax.random.normal(k, (BATCH, SEQ, HIDDEN), jnp.float32) for k in xkeys
    ]

    out = cross_scale_attention(scale_outputs, params)
    out = jax.block_until_ready(out)

    ref = _reference(scale_outputs, params)
    assert out.shape == (BATCH, SEQ, HIDDEN), out.shape
    # Softmax is exact now; remaining mismatch is only MXU f32 pass
    # decomposition vs. the XLA reference, well under 2e-3.
    assert jnp.allclose(out, ref, atol=2e-3, rtol=2e-3), (
        float(jnp.max(jnp.abs(out - ref))))

    print("KERNEL_OK")
</pallas_src>

<mosaic_0001>
module attributes {stable_mosaic.version = 11 : i64} {
  func.func @_cross_scale_kernel(%arg0: memref<2x24x32xf32, #tpu.memory_space<vmem>>, %arg1: memref<32x96xf32, #tpu.memory_space<vmem>>, %arg2: memref<1x96xf32, #tpu.memory_space<vmem>>, %arg3: memref<8x32xf32, #tpu.memory_space<vmem>>, %arg4: memref<192x24xf32, #tpu.memory_space<vmem>>, %arg5: memref<3x32x32xf32, #tpu.memory_space<vmem>>, %arg6: memref<1x32xf32, #tpu.memory_space<vmem>>, %arg7: memref<2x8x32xf32, #tpu.memory_space<vmem>>) attributes {dimension_semantics = [], scalar_prefetch = 0 : i64, scratch_operands = 0 : i64, tpu.core_type = #tpu.core_type<tc>} {
    %c0 = arith.constant 0 : index
    %c0_0 = arith.constant 0 : index
    %c0_1 = arith.constant 0 : index
    %0 = vector.load %arg0[%c0, %c0_0, %c0_1] : memref<2x24x32xf32, #tpu.memory_space<vmem>>, vector<2x24x32xf32>
    %1 = vector.shape_cast %0 : vector<2x24x32xf32> to vector<48x32xf32>
    %c0_2 = arith.constant 0 : index
    %c0_3 = arith.constant 0 : index
    %2 = vector.load %arg1[%c0_2, %c0_3] : memref<32x96xf32, #tpu.memory_space<vmem>>, vector<32x96xf32>
    %cst = arith.constant dense<0.000000e+00> : vector<48x96xf32>
    %3 = tpu.matmul %1, %2, %cst {dimension_numbers = #tpu.dot_dimension_numbers<[1], [0], [0], [1], [0, 0, 1, 1], [], []>} : vector<48x32xf32>, vector<32x96xf32>, vector<48x96xf32> -> vector<48x96xf32>
    %c0_4 = arith.constant 0 : index
    %c0_5 = arith.constant 0 : index
    %4 = vector.load %arg2[%c0_4, %c0_5] : memref<1x96xf32, #tpu.memory_space<vmem>>, vector<1x96xf32>
    %5 = vector.broadcast %4 : vector<1x96xf32> to vector<48x96xf32>
    %6 = arith.addf %3, %5 : vector<48x96xf32>
    %7 = vector.extract_strided_slice %6 {offsets = [0, 0], sizes = [48, 32], strides = [1, 1]} : vector<48x96xf32> to vector<48x32xf32>
    %8 = vector.shape_cast %7 : vector<48x32xf32> to vector<2x3x1x8x32xf32>
    %9 = vector.extract_strided_slice %6 {offsets = [0, 32], sizes = [48, 32], strides = [1, 1]} : vector<48x96xf32> to vector<48x32xf32>
    %10 = vector.shape_cast %9 : vector<48x32xf32> to vector<2x24x32xf32>
    %11 = vector.extract_strided_slice %6 {offsets = [0, 64], sizes = [48, 32], strides = [1, 1]} : vector<48x96xf32> to vector<48x32xf32>
    %12 = vector.shape_cast %11 : vector<48x32xf32> to vector<2x24x32xf32>
    %c0_6 = arith.constant 0 : index
    %c0_7 = arith.constant 0 : index
    %13 = vector.load %arg3[%c0_6, %c0_7] : memref<8x32xf32, #tpu.memory_space<vmem>>, vector<8x32xf32>
    %14 = vector.shape_cast %13 : vector<8x32xf32> to vector<1x1x8x1x32xf32>
    %15 = vector.broadcast %8 : vector<2x3x1x8x32xf32> to vector<2x3x8x8x32xf32>
    %16 = vector.broadcast %14 : vector<1x1x8x1x32xf32> to vector<2x3x8x8x32xf32>
    %17 = arith.mulf %15, %16 : vector<2x3x8x8x32xf32>
    %18 = vector.shape_cast %17 : vector<2x3x8x8x32xf32> to vector<2x192x32xf32>
    "tpu.trace_start"() <{level = 10 : i32, message = "bmh,bkh->bmk"}> : () -> ()
    %cst_8 = arith.constant dense<0.000000e+00> : vector<2x192x24xf32>
    %19 = tpu.matmul %18, %10, %cst_8 {dimension_numbers = #tpu.dot_dimension_numbers<[2], [2], [1], [1], [0, 0, 0, 1, 1, 1], [0], [0]>} : vector<2x192x32xf32>, vector<2x24x32xf32>, vector<2x192x24xf32> -> vector<2x192x24xf32>
    "tpu.trace_stop"() : () -> ()
    %c0_9 = arith.constant 0 : index
    %c0_10 = arith.constant 0 : index
    %20 = vector.load %arg4[%c0_9, %c0_10] : memref<192x24xf32, #tpu.memory_space<vmem>>, vector<192x24xf32>
    %21 = vector.shape_cast %20 : vector<192x24xf32> to vector<1x192x24xf32>
    %22 = vector.broadcast %21 : vector<1x192x24xf32> to vector<2x192x24xf32>
    %23 = arith.addf %19, %22 : vector<2x192x24xf32>
    %cst_11 = arith.constant dense<0xFF800000> : vector<2x192xf32>
    %24 = vector.multi_reduction <maximumf>, %23, %cst_11 [2] : vector<2x192x24xf32> to vector<2x192xf32>
    %25 = vector.shape_cast %24 : vector<2x192xf32> to vector<2x192x1xf32>
    %26 = vector.broadcast %25 : vector<2x192x1xf32> to vector<2x192x24xf32>
    %27 = arith.subf %23, %26 : vector<2x192x24xf32>
    %28 = math.exp %27 : vector<2x192x24xf32>
    %cst_12 = arith.constant dense<0.000000e+00> : vector<2x192xf32>
    %29 = vector.multi_reduction <add>, %28, %cst_12 [2] : vector<2x192x24xf32> to vector<2x192xf32>
    %30 = vector.shape_cast %29 : vector<2x192xf32> to vector<2x192x1xf32>
    %31 = vector.broadcast %30 : vector<2x192x1xf32> to vector<2x192x24xf32>
    %32 = arith.divf %28, %31 : vector<2x192x24xf32>
    "tpu.trace_start"() <{level = 10 : i32, message = "bmk,bkh->bmh"}> : () -> ()
    %cst_13 = arith.constant dense<0.000000e+00> : vector<2x192x32xf32>
    %33 = tpu.matmul %32, %12, %cst_13 {dimension_numbers = #tpu.dot_dimension_numbers<[2], [1], [1], [2], [0, 0, 0, 1, 1, 2], [0], [0]>} : vector<2x192x24xf32>, vector<2x24x32xf32>, vector<2x192x32xf32> -> vector<2x192x32xf32>
    "tpu.trace_stop"() : () -> ()
    %34 = vector.shape_cast %33 : vector<2x192x32xf32> to vector<2x3x8x8x32xf32>
    %35 = vector.shape_cast %13 : vector<8x32xf32> to vector<1x1x8x1x32xf32>
    %36 = vector.broadcast %35 : vector<1x1x8x1x32xf32> to vector<2x3x8x8x32xf32>
    %37 = arith.mulf %34, %36 : vector<2x3x8x8x32xf32>
    %cst_14 = arith.constant dense<0.000000e+00> : vector<2x3x8x32xf32>
    %38 = vector.multi_reduction <add>, %37, %cst_14 [2] : vector<2x3x8x8x32xf32> to vector<2x3x8x32xf32>
    %c0_15 = arith.constant 0 : index
    %c0_16 = arith.constant 0 : index
    %c0_17 = arith.constant 0 : index
    %39 = vector.load %arg5[%c0_15, %c0_16, %c0_17] : memref<3x32x32xf32, #tpu.memory_space<vmem>>, vector<3x32x32xf32>
    %cst_18 = arith.constant 0.000000e+00 : f32
    %40 = vector.broadcast %cst_18 : f32 to vector<16x32xf32>
    %41 = vector.extract_strided_slice %38 {offsets = [0, 0, 0, 0], sizes = [2, 1, 8, 32], strides = [1, 1, 1, 1]} : vector<2x3x8x32xf32> to vector<2x1x8x32xf32>
    %42 = vector.shape_cast %41 : vector<2x1x8x32xf32> to vector<2x8x32xf32>
    %43 = vector.shape_cast %42 : vector<2x8x32xf32> to vector<16x32xf32>
    %44 = vector.extract_strided_slice %39 {offsets = [0, 0, 0], sizes = [1, 32, 32], strides = [1, 1, 1]} : vector<3x32x32xf32> to vector<1x32x32xf32>
    %45 = vector.shape_cast %44 : vector<1x32x32xf32> to vector<32x32xf32>
    %cst_19 = arith.constant dense<0.000000e+00> : vector<16x32xf32>
    %46 = tpu.matmul %43, %45, %cst_19 {dimension_numbers = #tpu.dot_dimension_numbers<[1], [0], [0], [1], [0, 0, 1, 1], [], []>} : vector<16x32xf32>, vector<32x32xf32>, vector<16x32xf32> -> vector<16x32xf32>
    %47 = arith.addf %40, %46 : vector<16x32xf32>
    %48 = vector.extract_strided_slice %38 {offsets = [0, 1, 0, 0], sizes = [2, 1, 8, 32], strides = [1, 1, 1, 1]} : vector<2x3x8x32xf32> to vector<2x1x8x32xf32>
    %49 = vector.shape_cast %48 : vector<2x1x8x32xf32> to vector<2x8x32xf32>
    %50 = vector.shape_cast %49 : vector<2x8x32xf32> to vector<16x32xf32>
    %51 = vector.extract_strided_slice %39 {offsets = [1, 0, 0], sizes = [1, 32, 32], strides = [1, 1, 1]} : vector<3x32x32xf32> to vector<1x32x32xf32>
    %52 = vector.shape_cast %51 : vector<1x32x32xf32> to vector<32x32xf32>
    %cst_20 = arith.constant dense<0.000000e+00> : vector<16x32xf32>
    %53 = tpu.matmul %50, %52, %cst_20 {dimension_numbers = #tpu.dot_dimension_numbers<[1], [0], [0], [1], [0, 0, 1, 1], [], []>} : vector<16x32xf32>, vector<32x32xf32>, vector<16x32xf32> -> vector<16x32xf32>
    %54 = arith.addf %47, %53 : vector<16x32xf32>
    %55 = vector.extract_strided_slice %38 {offsets = [0, 2, 0, 0], sizes = [2, 1, 8, 32], strides = [1, 1, 1, 1]} : vector<2x3x8x32xf32> to vector<2x1x8x32xf32>
    %56 = vector.shape_cast %55 : vector<2x1x8x32xf32> to vector<2x8x32xf32>
    %57 = vector.shape_cast %56 : vector<2x8x32xf32> to vector<16x32xf32>
    %58 = vector.extract_strided_slice %39 {offsets = [2, 0, 0], sizes = [1, 32, 32], strides = [1, 1, 1]} : vector<3x32x32xf32> to vector<1x32x32xf32>
    %59 = vector.shape_cast %58 : vector<1x32x32xf32> to vector<32x32xf32>
    %cst_21 = arith.constant dense<0.000000e+00> : vector<16x32xf32>
    %60 = tpu.matmul %57, %59, %cst_21 {dimension_numbers = #tpu.dot_dimension_numbers<[1], [0], [0], [1], [0, 0, 1, 1], [], []>} : vector<16x32xf32>, vector<32x32xf32>, vector<16x32xf32> -> vector<16x32xf32>
    %61 = arith.addf %54, %60 : vector<16x32xf32>
    %c0_22 = arith.constant 0 : index
    %c0_23 = arith.constant 0 : index
    %62 = vector.load %arg6[%c0_22, %c0_23] : memref<1x32xf32, #tpu.memory_space<vmem>>, vector<1x32xf32>
    %63 = vector.broadcast %62 : vector<1x32xf32> to vector<16x32xf32>
    %64 = arith.addf %61, %63 : vector<16x32xf32>
    %65 = vector.shape_cast %64 : vector<16x32xf32> to vector<2x8x32xf32>
    %c0_24 = arith.constant 0 : index
    %c0_25 = arith.constant 0 : index
    %c0_26 = arith.constant 0 : index
    %66 = vector.load %arg7[%c0_24, %c0_25, %c0_26] : memref<2x8x32xf32, #tpu.memory_space<vmem>>, vector<2x8x32xf32>
    tpu.vector_store %arg7[%c0_24, %c0_25, %c0_26], %65 {strides = array<i32>} : memref<2x8x32xf32, #tpu.memory_space<vmem>>, vector<2x8x32xf32>,
    return
  }
}

</mosaic_0001>

<bundles_post_ra>
// kernel: tpu_custom_call.1
= control target key start
LH: loop header
LB: loop body
LE: loop exit
PB: predicated region body
PF: predicated region fallthrough
CT: control target
= control target key end

     0   :  { %vm44_vm0 = vcmask 261120   ;;  %s4204_s0 = inlined_call_operand.vmem [shape: f32[2,24,32], index: 0, kind: input, shape index: {}]   ;;  %s4205_s1 = inlined_call_operand.vmem [shape: f32[32,96], index: 1, kind: input, shape index: {}]   ;;  %s4206_s2 = inlined_call_operand.vmem [shape: f32[1,96], index: 2, kind: input, shape index: {}]   ;;  %s4207_s3 = inlined_call_operand.vmem [shape: f32[8,32], index: 3, kind: input, shape index: {}]   ;;  %s4208_s4 = inlined_call_operand.vmem [shape: f32[192,24], index: 4, kind: input, shape index: {}]   ;;  %s4209_s5 = inlined_call_operand.vmem [shape: f32[3,32,32], index: 5, kind: input, shape index: {}]   ;;  %s4210_s6 = inlined_call_operand.vmem [shape: f32[1,32], index: 6, kind: input, shape index: {}]   ;;  %s4211_s7 = inlined_call_operand.hbm [shape: f32[2,8,32], index: 7, kind: output, shape index: {}]  }
   0x1   :  { %v33_v0 = vld [vmem:[%s4205_s1] sm:$0xff]  ;;  %v34_v1 = vld [vmem:[%s4205_s1 + $0x8] sm:$0xff]  ;;  %v35_v2 = vld [vmem:[%s4205_s1 + $0x10] sm:$0xff] }
   0x2   :  { %v2818_v3 = vpack.c.bf16 %v34_v1, %v33_v0  ;;  %v36_v4 = vld [vmem:[%s4205_s1 + $0x18] sm:$0xff]  ;;  %v27_v5 = vld [vmem:[%s4204_s0] sm:$0xff] }
   0x3   :  { %v2822_v6 = vpack.c.bf16 %v36_v4, %v35_v2  ;;  %2608 = vmatprep.mubr.msk.f32.mxu0 %vm44_vm0, %v27_v5 }
   0x4   :  { %2819 = vmatprep.subr.bf16.mxu0 %v2818_v3 }
   0x5   :  { %12 = vsyncpa [#allocation3], 0  ;;  %2821 = vmatpush3.bf16.msra.mxu0 %v2818_v3  ;;  %v28_v7 = vld [vmem:[%s4204_s0 + $0x8] sm:$0xff]  ;;  %v29_v8 = vld [vmem:[%s4204_s0 + $0x10] sm:$0xff]  ;;  %v3117_v12 = vmov 1966171168   ;;  %v164_v14 = vlaneseq }
   0x6   :  { %2823 = vmatprep.subr.bf16.mxu0 %v2822_v6  ;;  %v30_v9 = vld [vmem:[%s4204_s0 + $0x18] sm:$0xff]  ;;  %v31_v10 = vld [vmem:[%s4204_s0 + $0x20] sm:$0xff]  ;;  %v32_v11 = vld [vmem:[%s4204_s0 + $0x28] sm:$0xff]  ;;  %v162_v13 = vunpack.c.l.s4 %v3117_v12  ;;  %s3119_s22 = smov 64   ;;  %vm865_vm2 = vcmask 195584   ;;  %s3120_s17 = smov [#allocation2]  }
   0x7   :  { %v165_v16 = vshrl.u32 %v164_v14, 7  ;;  %v158_v17 = vld [vmem:[%s4207_s3] sm:$0xff]  ;;  %vm3249_vm1 = vmpackc.low %vm44_vm0, %vm44_vm0  ;;  %s2337_s18 = sshll.u32 %s3120_s17, 4  ;;  %s2338_s18 = int_to_ptr.vmem [resolvable:$true] %s2337_s18 }
   0x8   :  { %v163_v15 = vunpack.c.0.s8 %v162_v13  ;;  %v160_v18 = vcombine.high %v158_v17, %v158_v17  ;;  %v2348_v40 = vld [vmem:[%s4206_s2] ss:$0 sm:$0xff]  ;;  %s3118_s2 = smov 96   ;;  %s3093_s19 = scalar_lea.vmem %s2338_s18, 256 }
   0x9   :  { %2825 = vmatpush3.bf16.msra.mxu0 %v2822_v6  ;;  %v211_v29 = vsub.s32 0, %v165_v16  ;;  %p3094_p0 = scmp.ne.s32.totalorder %s2338_s18, %s3093_s19  ;;  %p3098_p1 = scmp.lt.s32.totalorder %s2338_s18, %s2338_s18 }
   0xa   :  { %v166_v19 = vsub.s32 %v163_v15, %v165_v16  ;;  %p3099_p2 = scmp.lt.s32.totalorder %s3093_s19, %s3093_s19 }
   0xc   :  { %2609 = vmatmul.mubr.msk.f32.vlgmr.msra.gmra.mrb[0].mxu0 %vm44_vm0, %v28_v7  ;;  %v167_v20 = vrot.slane %v158_v17, %v166_v19  ;;  %v174_v21 = vrot.slane %v160_v18, %v166_v19  ;;  %p3100_p3 = por %p3099_p2, %p3098_p1 }
   0xd   :  { %2611 = vmatprep.mubr.msk.f32.mxu0 %vm44_vm0, %v29_v8 }
   0xe   :  { %v175_v22 = vcombine.high %v167_v20, %v167_v20  ;;  %v176_v23 = vcombine.high %v174_v21, %v174_v21  ;;  %v183_v24 = vrot.slane %v167_v20, %v166_v19  ;;  %v190_v26 = vrot.slane %v174_v21, %v166_v19  ;;  %p3101_p4 = pnand %p3100_p3, %p3094_p0 }
  0x10   :  { %2612 = vmatmul.mubr.msk.f32.gmra.mrb[2].mxu0 %vm44_vm0, %v30_v9  ;;  %v197_v25 = vrot.slane %v175_v22, %v166_v19  ;;  %v204_v27 = vrot.slane %v176_v23, %v166_v19  ;;  %v205_v28 = vcombine.high %v183_v24, %v183_v24  ;;  %v206_v33 = vcombine.high %v190_v26, %v190_v26 }
  0x11   :  { %2614 = vmatprep.mubr.msk.f32.mxu0 %vm44_vm0, %v31_v10  ;;  %v3208_v35 = vrot.slane %v190_v26, %v211_v29  ;;  %v3219_v42 = vrot.slane %v183_v24, %v211_v29 }
  0x12   :  { %v207_v30 = vcombine.high %v197_v25, %v197_v25  ;;  %v3202_v31 = vrot.slane %v197_v25, %v211_v29  ;;  %v3204_v32 = vrot.slane %v205_v28, %v211_v29  ;;  %v3210_v36 = vrot.slane %v204_v27, %v211_v29 }
  0x13   :  { %4226 = vst [vmem:[#allocation7_spill] sm:$0xff] %v3208_v35  ;;  %v208_v37 = vcombine.high %v204_v27, %v204_v27  ;;  %v3212_v38 = vrot.slane %v206_v33, %v211_v29 }
  0x14   :  { %2615 = vmatmul.mubr.msk.f32.gmra.mrb[4].mxu0 %vm44_vm0, %v32_v11  ;;  %4224 = vst [vmem:[#allocation5_spill] sm:$0xff] %v3204_v32  ;;  %v3206_v34 = vrot.slane %v207_v30, %v211_v29  ;;  %4227 = vst [vmem:[#allocation8_spill] sm:$0xff] %v3210_v36 }
  0x15   :  { %4228 = vst [vmem:[#allocation9_spill] sm:$0xff] %v3212_v38  ;;  %v3214_v39 = vrot.slane %v208_v37, %v211_v29 }
  0x16   :  { %4225 = vst [vmem:[#allocation6_spill] sm:$0xff] %v3206_v34 }
  0x17   :  { %4229 = vst [vmem:[#allocation10_spill] sm:$0xff] %v3214_v39 }
  0xdf   :  { %v2610_v41 = vpop.f32.mrb[0].mxu0 }
  0xe0   :  { %v3221_v43 = vadd.f32 %v2610_v41, %v2348_v40  ;;  %v129_v44 = vpop.f32.mrb[1].mxu0 }
  0xe1   :  { %v3223_v45 = vadd.f32 %v2348_v40, %v129_v44 }
  0xe2   :  { %v257_v25 = vmul.f32 %v3219_v42, %v3221_v43  ;;  %v258_v27 = vmul.f32 %v3202_v31, %v3221_v43  ;;  %v259_v29 = vmul.f32 %v3204_v32, %v3221_v43  ;;  %v260_v33 = vmul.f32 %v3206_v34, %v3221_v43 }
  0xe3   :  { %v2613_v46 = vpop.f32.mrb[2].mxu0  ;;  %v2880_v47 = vpack.i.bf16 %v3221_v43, %v3223_v45  ;;  %v249_v48 = vmul.f32 %v3219_v42, %v3223_v45  ;;  %v250_v10 = vmul.f32 %v3202_v31, %v3223_v45  ;;  %v251_v12 = vmul.f32 %v3204_v32, %v3223_v45 }
  0xe4   :  { %v3229_v49 = vadd.f32 %v2613_v46, %v2348_v40  ;;  %v139_v50 = vpop.f32.mrb[3].mxu0  ;;  %v252_v15 = vmul.f32 %v3206_v34, %v3223_v45  ;;  %v253_v16 = vmul.f32 %v3208_v35, %v3223_v45  ;;  %v254_v18 = vmul.f32 %v3210_v36, %v3223_v45 }
  0xe5   :  { %v3231_v51 = vadd.f32 %v2348_v40, %v139_v50  ;;  %2881 = vrot.lane.b32.xlu0 %v2880_v47, %s3118_s2  ;;  %2623 = vmatprep.mubr.msk.f32.mxu1 %vm44_vm0, %v249_v48  ;;  %v255_v20 = vmul.f32 %v3212_v38, %v3223_v45  ;;  %v256_v23 = vmul.f32 %v3214_v39, %v3223_v45 }
  0xe6   :  { %v273_v52 = vmul.f32 %v3219_v42, %v3229_v49  ;;  %v274_v19 = vmul.f32 %v3202_v31, %v3229_v49  ;;  %v275_v21 = vmul.f32 %v3204_v32, %v3229_v49  ;;  %v276_v24 = vmul.f32 %v3206_v34, %v3229_v49 }
  0xe7   :  { %v2616_v53 = vpop.f32.mrb[4].mxu0  ;;  %328 = vrot.lane.b32.xlu1 %v3231_v51, %s3118_s2  ;;  %v277_v26 = vmul.f32 %v3208_v35, %v3229_v49  ;;  %v278_v28 = vmul.f32 %v3210_v36, %v3229_v49  ;;  %v279_v30 = vmul.f32 %v3212_v38, %v3229_v49  ;;  %v280_v37 = vmul.f32 %v3214_v39, %v3229_v49 }
  0xe8   :  { %v3237_v54 = vadd.f32 %v2616_v53, %v2348_v40  ;;  %v149_v55 = vpop.f32.mrb[5].mxu0  ;;  %2665 = vmatprep.mubr.msk.f32.mxu0 %vm44_vm0, %v273_v52  ;;  %v262_v44 = vmul.f32 %v3210_v36, %v3221_v43  ;;  %v263_v46 = vmul.f32 %v3212_v38, %v3221_v43  ;;  %v264_v48 = vmul.f32 %v3214_v39, %v3221_v43 }
  0xe9   :  { %v3240_v56 = vadd.f32 %v2348_v40, %v149_v55  ;;  %v261_v40 = vmul.f32 %v3208_v35, %v3221_v43  ;;  %v265_v50 = vmul.f32 %v3219_v42, %v3231_v51  ;;  %v266_v43 = vmul.f32 %v3202_v31, %v3231_v51 }
  0xea   :  { %v267_v55 = vmul.f32 %v3204_v32, %v3231_v51  ;;  %v270_v62 = vmul.f32 %v3210_v36, %v3231_v51 }
  0xeb   :  { %600 = vrot.lane.b32.xlu1 %v3237_v54, %s3118_s2  ;;  %v2885_v57 = vpack.i.bf16 %v3240_v56, %v3229_v49  ;;  %v281_v41 = vmul.f32 %v3219_v42, %v3240_v56  ;;  %v282_v45 = vmul.f32 %v3202_v31, %v3240_v56  ;;  %v284_v49 = vmul.f32 %v3206_v34, %v3240_v56 }
  0xec   :  { %v285_v52 = vmul.f32 %v3208_v35, %v3240_v56  ;;  %v286_v53 = vmul.f32 %v3210_v36, %v3240_v56 }
  0xed   :  { %2886 = vrot.lane.b32.xlu0 %v2885_v57, %s3118_s2 }
  0xef   :  { %1398 = vrot.lane.b32.xlu1 %v3231_v51, %s3119_s22 }
  0xf1   :  { %2891 = vrot.lane.b32.xlu0 %v2880_v47, %s3119_s22  ;;  %v283_v47 = vmul.f32 %v3204_v32, %v3240_v56 }
  0xf3   :  { %2896 = vrot.lane.b32.xlu1 %v2885_v57, %s3119_s22  ;;  %v287_v57 = vmul.f32 %v3212_v38, %v3240_v56 }
  0xf5   :  { %1664 = vrot.lane.b32.xlu0 %v3237_v54, %s3119_s22 }
 0x157   :  { %v2882_v58 = vpop.permute.xlu0 %2881 }
 0x158   :  { %v2884_v59 = vunpack.i.h.bf16 %v2882_v58  ;;  %v2883_v60 = vunpack.i.l.bf16 %v2882_v58  ;;  %v268_v58 = vmul.f32 %v3206_v34, %v3231_v51 }
 0x159   :  { %v329_v61 = vpop.permute.xlu1 %328 }
 0x15a   :  { %v2826_v63 = vpack.c.bf16 %v2884_v59, %v2883_v60  ;;  %v288_v59 = vmul.f32 %v3214_v39, %v3240_v56  ;;  %v269_v60 = vmul.f32 %v3208_v35, %v3231_v51  ;;  %v290_v56 = vmul.f32 %v3202_v31, %v3237_v54 }
 0x15c   :  { %2828 = vmatprep.subr.msk.bf16.mxu1 %vm3249_vm1, %v2826_v63 }
 0x15d   :  { %v601_v0 = vpop.permute.xlu1 %600  ;;  %2831 = vmatpush3.bf16.xpose.msk.msra.mxu1 %vm3249_vm1, %v2826_v63  ;;  %v271_v63 = vmul.f32 %v3212_v38, %v3231_v51 }
 0x15e   :  { %2621 = vmatprep.subr.msk.mxu1 %vm44_vm0, %v329_v61 }
 0x15f   :  { %v2887_v1 = vpop.permute.xlu0 %2886 }
 0x160   :  { %v2889_v2 = vunpack.i.h.bf16 %v2887_v1  ;;  %v2888_v3 = vunpack.i.l.bf16 %v2887_v1  ;;  %v272_v1 = vmul.f32 %v3214_v39, %v3231_v51  ;;  %v296_v51 = vmul.f32 %v3214_v39, %v3237_v54  ;;  %v312_v39 = vld [vmem:[%s4208_s4 + $0x78] sm:$0xff] }
 0x161   :  { %v1399_v4 = vpop.permute.xlu1 %1398 }
 0x162   :  { %v2832_v5 = vpack.c.bf16 %v2889_v2, %v2888_v3  ;;  %v292_v2 = vmul.f32 %v3206_v34, %v3237_v54  ;;  %v293_v3 = vmul.f32 %v3208_v35, %v3237_v54 }
 0x163   :  { %v2892_v6 = vpop.permute.xlu0 %2891 }
 0x164   :  { %v2894_v7 = vunpack.i.h.bf16 %v2892_v6  ;;  %v2893_v8 = vunpack.i.l.bf16 %v2892_v6  ;;  %2834 = vmatprep.subr.msk.bf16.mxu0 %vm3249_vm1, %v2832_v5  ;;  %v298_v6 = vld [vmem:[%s4208_s4 + $0x8] sm:$0xff] }
 0x165   :  { %v2897_v9 = vpop.permute.xlu1 %2896  ;;  %2622 = vmatpush3.xpose.msk.msra.mxu1 %vm44_vm0, %v329_v61  ;;  %2837 = vmatpush3.bf16.xpose.msk.msra.mxu0 %vm3249_vm1, %v2832_v5  ;;  %v289_v61 = vmul.f32 %v3219_v42, %v3237_v54  ;;  %v295_v5 = vmul.f32 %v3212_v38, %v3237_v54 }
 0x166   :  { %2663 = vmatprep.subr.msk.mxu0 %vm44_vm0, %v601_v0  ;;  %v2838_v11 = vpack.c.bf16 %v2894_v7, %v2893_v8  ;;  %v2899_v13 = vunpack.i.h.bf16 %v2897_v9  ;;  %v2898_v14 = vunpack.i.l.bf16 %v2897_v9  ;;  %v297_v7 = vld [vmem:[%s4208_s4] sm:$0xff] }
 0x167   :  { %v1665_v22 = vpop.permute.xlu0 %1664 }
 0x168   :  { %2624 = vmatmul.mubr.msk.f32.vlgmr.msra.gmra.mrb[0].mxu1 %vm44_vm0, %v250_v10  ;;  %2839 = vmatprep.subr.bf16.mxu1 %v2838_v11  ;;  %v2842_v17 = vpack.c.bf16 %v2899_v13, %v2898_v14  ;;  %v299_v13 = vld [vmem:[%s4208_s4 + $0x10] sm:$0xff] }
 0x169   :  { %2626 = vmatprep.mubr.msk.f32.mxu1 %vm44_vm0, %v251_v12  ;;  %2841 = vmatpush3.bf16.msra.mxu1 %v2838_v11 }
 0x16a   :  { %2705 = vmatprep.subr.mxu1 %v1399_v4 }
 0x16c   :  { %2627 = vmatmul.mubr.msk.f32.gmra.mrb[2].mxu1 %vm44_vm0, %v252_v15 }
 0x16d   :  { %2629 = vmatprep.mubr.msk.f32.mxu1 %vm44_vm0, %v253_v16  ;;  %2664 = vmatpush3.xpose.msk.msra.mxu0 %vm44_vm0, %v601_v0  ;;  %v291_v0 = vmul.f32 %v3204_v32, %v3237_v54 }
 0x16e   :  { %2706 = vmatpush3.msra.mxu1 %v1399_v4  ;;  %2843 = vmatprep.subr.bf16.mxu0 %v2842_v17  ;;  %v294_v4 = vmul.f32 %v3210_v36, %v3237_v54  ;;  %v300_v54 = vld [vmem:[%s4208_s4 + $0x18] sm:$0xff] }
 0x170   :  { %2630 = vmatmul.mubr.msk.f32.gmra.mrb[4].mxu1 %vm44_vm0, %v254_v18  ;;  %2666 = vmatmul.mubr.msk.f32.vlgmr.msra.gmra.mrb[6].mxu0 %vm44_vm0, %v274_v19  ;;  %v301_v19 = vld [vmem:[%s4208_s4 + $0x20] sm:$0xff] }
 0x171   :  { %2632 = vmatprep.mubr.msk.f32.mxu1 %vm44_vm0, %v255_v20  ;;  %2668 = vmatprep.mubr.msk.f32.mxu0 %vm44_vm0, %v275_v21 }
 0x172   :  { %2845 = vmatpush3.bf16.msra.mxu0 %v2842_v17 }
 0x173   :  { %2747 = vmatprep.subr.mxu0 %v1665_v22 }
 0x174   :  { %2633 = vmatmul.mubr.msk.f32.gmra.mrb[6].mxu1 %vm44_vm0, %v256_v23  ;;  %2669 = vmatmul.mubr.msk.f32.gmra.mrb[8].mxu0 %vm44_vm0, %v276_v24  ;;  %v302_v24 = vld [vmem:[%s4208_s4 + $0x28] sm:$0xff] }
 0x175   :  { %2635 = vmatprep.mubr.msk.f32.mxu1 %vm44_vm0, %v257_v25  ;;  %2671 = vmatprep.mubr.msk.f32.mxu0 %vm44_vm0, %v277_v26 }
 0x176   :  { %2748 = vmatpush3.msra.mxu0 %v1665_v22 }
 0x178   :  { %2636 = vmatmul.mubr.msk.f32.gmra.mrb[8].mxu1 %vm44_vm0, %v258_v27  ;;  %2672 = vmatmul.mubr.msk.f32.gmra.mrb[10].mxu0 %vm44_vm0, %v278_v28 }
 0x179   :  { %2638 = vmatprep.mubr.msk.f32.mxu1 %vm44_vm0, %v259_v29  ;;  %2674 = vmatprep.mubr.msk.f32.mxu0 %vm44_vm0, %v279_v30 }
 0x17c   :  { %2639 = vmatmul.mubr.msk.f32.gmra.mrb[10].mxu1 %vm44_vm0, %v260_v33  ;;  %2675 = vmatmul.mubr.msk.f32.gmra.mrb[12].mxu0 %vm44_vm0, %v280_v37 }
 0x17d   :  { %2641 = vmatprep.mubr.msk.f32.mxu1 %vm44_vm0, %v261_v40  ;;  %2677 = vmatprep.mubr.msk.f32.mxu0 %vm44_vm0, %v281_v41 }
 0x180   :  { %2642 = vmatmul.mubr.msk.f32.gmra.mrb[12].mxu1 %vm44_vm0, %v262_v44  ;;  %2678 = vmatmul.mubr.msk.f32.gmra.mrb[14].mxu0 %vm44_vm0, %v282_v45  ;;  %v303_v44 = vld [vmem:[%s4208_s4 + $0x30] sm:$0xff] }
 0x181   :  { %2644 = vmatprep.mubr.msk.f32.mxu1 %vm44_vm0, %v263_v46  ;;  %2680 = vmatprep.mubr.msk.f32.mxu0 %vm44_vm0, %v283_v47 }
 0x184   :  { %2645 = vmatmul.mubr.msk.f32.gmra.mrb[14].mxu1 %vm44_vm0, %v264_v48  ;;  %2681 = vmatmul.mubr.msk.f32.gmra.mrb[16].mxu0 %vm44_vm0, %v284_v49 }
 0x185   :  { %2647 = vmatprep.mubr.msk.f32.mxu1 %vm44_vm0, %v265_v50  ;;  %2683 = vmatprep.mubr.msk.f32.mxu0 %vm44_vm0, %v285_v52 }
 0x188   :  { %2648 = vmatmul.mubr.msk.f32.gmra.mrb[16].mxu1 %vm44_vm0, %v266_v43  ;;  %2684 = vmatmul.mubr.msk.f32.gmra.mrb[18].mxu0 %vm44_vm0, %v286_v53 }
 0x189   :  { %2650 = vmatprep.mubr.msk.f32.mxu1 %vm44_vm0, %v267_v55  ;;  %2686 = vmatprep.mubr.msk.f32.mxu0 %vm44_vm0, %v287_v57 }
 0x18c   :  { %2651 = vmatmul.mubr.msk.f32.gmra.mrb[18].mxu1 %vm44_vm0, %v268_v58  ;;  %2687 = vmatmul.mubr.msk.f32.gmra.mrb[20].mxu0 %vm44_vm0, %v288_v59 }
 0x18d   :  { %2653 = vmatprep.mubr.msk.f32.mxu1 %vm44_vm0, %v269_v60  ;;  %2689 = vmatprep.mubr.msk.f32.mxu0 %vm44_vm0, %v289_v61 }
 0x190   :  { %2654 = vmatmul.mubr.msk.f32.gmra.mrb[20].mxu1 %vm44_vm0, %v270_v62  ;;  %2690 = vmatmul.mubr.msk.f32.gmra.mrb[22].mxu0 %vm44_vm0, %v290_v56  ;;  %v304_v56 = vld [vmem:[%s4208_s4 + $0x38] sm:$0xff] }
 0x191   :  { %2656 = vmatprep.mubr.msk.f32.mxu1 %vm44_vm0, %v271_v63  ;;  %2692 = vmatprep.mubr.msk.f32.mxu0 %vm44_vm0, %v291_v0  ;;  %v305_v63 = vld [vmem:[%s4208_s4 + $0x40] sm:$0xff] }
 0x194   :  { %2657 = vmatmul.mubr.msk.f32.gmra.mrb[22].mxu1 %vm44_vm0, %v272_v1  ;;  %2693 = vmatmul.mubr.msk.f32.gmra.mrb[24].mxu0 %vm44_vm0, %v292_v2 }
 0x195   :  { %2695 = vmatprep.mubr.msk.f32.mxu0 %vm44_vm0, %v293_v3 }
 0x198   :  { %2696 = vmatmul.mubr.msk.f32.gmra.mrb[26].mxu0 %vm44_vm0, %v294_v4 }
 0x199   :  { %2698 = vmatprep.mubr.msk.f32.mxu0 %vm44_vm0, %v295_v5 }
 0x19c   :  { %2699 = vmatmul.mubr.msk.f32.gmra.mrb[28].mxu0 %vm44_vm0, %v296_v51 }
 0x23b   :  { %v2625_v8 = vpop.f32.mrb[0].mxu1 }
 0x23c   :  { %v3409_v9 = vadd.f32 %v2625_v8, %v298_v6  ;;  %v474_v10 = vpop.f32.mrb[1].mxu1 }
 0x23d   :  { %v3411_v11 = vadd.f32 %v474_v10, %v297_v7 }
 0x23e   :  { %v869_v12 = vsel %vm865_vm2, %v3409_v9, -inf }
 0x23f   :  { %870 = vmax.xlane.f32.xlu1 %v869_v12  ;;  %v2628_v14 = vpop.f32.mrb[2].mxu1  ;;  %v866_v15 = vsel %vm865_vm2, %v3411_v11, -inf }
 0x240   :  { %v3423_v16 = vadd.f32 %v2628_v14, %v300_v54  ;;  %v484_v17 = vpop.f32.mrb[3].mxu1  ;;  %867 = vmax.xlane.f32.xlu0 %v866_v15 }
 0x241   :  { %v3425_v18 = vadd.f32 %v484_v17, %v299_v13  ;;  %v306_v17 = vld [vmem:[%s4208_s4 + $0x48] sm:$0xff] }
 0x242   :  { %v875_v20 = vsel %vm865_vm2, %v3423_v16, -inf }
 0x243   :  { %v2631_v21 = vpop.f32.mrb[4].mxu1  ;;  %v2667_v22 = vpop.f32.mrb[6].mxu0  ;;  %v872_v23 = vsel %vm865_vm2, %v3425_v18, -inf }
 0x244   :  { %v3437_v25 = vadd.f32 %v2667_v22, %v298_v6  ;;  %v494_v26 = vpop.f32.mrb[5].mxu1  ;;  %v746_v27 = vpop.f32.mrb[7].mxu0  ;;  %873 = vmax.xlane.f32.xlu1 %v872_v23  ;;  %876 = vmax.xlane.f32.xlu0 %v875_v20  ;;  %v3443_v30 = vadd.f32 %v2631_v21, %v302_v24 }
 0x245   :  { %v3439_v28 = vadd.f32 %v494_v26, %v301_v19  ;;  %v3452_v47 = vadd.f32 %v746_v27, %v297_v7 }
 0x246   :  { %v941_v29 = vsel %vm865_vm2, %v3437_v25, -inf  ;;  %v881_v43 = vsel %vm865_vm2, %v3443_v30, -inf }
 0x247   :  { %v2634_v33 = vpop.f32.mrb[6].mxu1  ;;  %v2670_v37 = vpop.f32.mrb[8].mxu0  ;;  %v878_v40 = vsel %vm865_vm2, %v3439_v28, -inf  ;;  %v938_v62 = vsel %vm865_vm2, %v3452_v47, -inf }
 0x248   :  { %v504_v41 = vpop.f32.mrb[7].mxu1  ;;  %v756_v45 = vpop.f32.mrb[9].mxu0  ;;  %879 = vmax.xlane.f32.xlu1 %v878_v40  ;;  %942 = vmax.xlane.f32.xlu0 %v941_v29  ;;  %v3460_v57 = vadd.f32 %v2670_v37, %v300_v54  ;;  %v3474_v2 = vadd.f32 %v2634_v33, %v304_v56 }
 0x249   :  { %v3450_v46 = vadd.f32 %v756_v45, %v299_v13  ;;  %v3454_v48 = vadd.f32 %v504_v41, %v303_v44 }
 0x24a   :  { %v947_v6 = vsel %vm865_vm2, %v3460_v57, -inf  ;;  %v887_v15 = vsel %vm865_vm2, %v3474_v2, -inf }
 0x24b   :  { %v2637_v49 = vpop.f32.mrb[8].mxu1  ;;  %v2673_v50 = vpop.f32.mrb[10].mxu0  ;;  %v944_v52 = vsel %vm865_vm2, %v3450_v46, -inf  ;;  %v884_v61 = vsel %vm865_vm2, %v3454_v48, -inf }
 0x24c   :  { %v514_v53 = vpop.f32.mrb[9].mxu1  ;;  %v766_v55 = vpop.f32.mrb[11].mxu0  ;;  %945 = vmax.xlane.f32.xlu1 %v944_v52  ;;  %882 = vmax.xlane.f32.xlu0 %v881_v43  ;;  %v3484_v10 = vadd.f32 %v2673_v50, %v302_v24  ;;  %v3500_v22 = vadd.f32 %v2637_v49, %v306_v17  ;;  %v308_v52 = vld [vmem:[%s4208_s4 + $0x58] sm:$0xff]  ;;  %v309_v43 = vld [vmem:[%s4208_s4 + $0x60] sm:$0xff] }
 0x24d   :  { %v3462_v58 = vadd.f32 %v766_v55, %v301_v19  ;;  %v3476_v3 = vadd.f32 %v514_v53, %v305_v63  ;;  %v307_v19 = vld [vmem:[%s4208_s4 + $0x50] sm:$0xff] }
 0x24e   :  { %v953_v29 = vsel %vm865_vm2, %v3484_v10, -inf  ;;  %v893_v50 = vsel %vm865_vm2, %v3500_v22, -inf }
 0x24f   :  { %v2640_v59 = vpop.f32.mrb[10].mxu1  ;;  %v2676_v60 = vpop.f32.mrb[12].mxu0  ;;  %v950_v51 = vsel %vm865_vm2, %v3462_v58, -inf  ;;  %v890_v14 = vsel %vm865_vm2, %v3476_v3, -inf }
 0x250   :  { %v524_v0 = vpop.f32.mrb[11].mxu1  ;;  %v776_v1 = vpop.f32.mrb[13].mxu0  ;;  %885 = vmax.xlane.f32.xlu1 %v884_v61  ;;  %939 = vmax.xlane.f32.xlu0 %v938_v62  ;;  %v3512_v40 = vadd.f32 %v2676_v60, %v304_v56  ;;  %v3530_v60 = vadd.f32 %v2640_v59, %v308_v52 }
 0x251   :  { %v3486_v54 = vadd.f32 %v776_v1, %v303_v44  ;;  %v3502_v23 = vadd.f32 %v524_v0, %v307_v19 }
 0x252   :  { %v959_v0 = vsel %vm865_vm2, %v3512_v40, -inf }
 0x253   :  { %v3478_v4 = vpop.f32.mrb[12].mxu1  ;;  %v2679_v5 = vpop.f32.mrb[14].mxu0  ;;  %v956_v27 = vsel %vm865_vm2, %v3486_v54, -inf  ;;  %v896_v49 = vsel %vm865_vm2, %v3502_v23, -inf }
 0x254   :  { %v534_v7 = vpop.f32.mrb[13].mxu1  ;;  %v786_v8 = vpop.f32.mrb[15].mxu0  ;;  %951 = vmax.xlane.f32.xlu1 %v950_v51  ;;  %948 = vmax.xlane.f32.xlu0 %v947_v6  ;;  %v3544_v6 = vadd.f32 %v2679_v5, %v306_v17  ;;  %v311_v5 = vld [vmem:[%s4208_s4 + $0x70] sm:$0xff] }
 0x255   :  { %v3514_v41 = vadd.f32 %v786_v8, %v305_v63  ;;  %v3532_v61 = vadd.f32 %v534_v7, %v309_v43 }
 0x257   :  { %v3488_v12 = vpop.f32.mrb[14].mxu1  ;;  %v2682_v13 = vpop.f32.mrb[16].mxu0  ;;  %v962_v63 = vsel %vm865_vm2, %v3514_v41, -inf }
 0x258   :  { %v544_v20 = vpop.f32.mrb[15].mxu1  ;;  %v796_v21 = vpop.f32.mrb[17].mxu0  ;;  %891 = vmax.xlane.f32.xlu1 %v890_v14  ;;  %888 = vmax.xlane.f32.xlu0 %v887_v15  ;;  %v902_v14 = vsel %vm865_vm2, %v3532_v61, -inf  ;;  %v899_v15 = vsel %vm865_vm2, %v3530_v60, -inf  ;;  %v3575_v38 = vadd.f32 %v2682_v13, %v308_v52 }
 0x259   :  { %v3546_v59 = vadd.f32 %v796_v21, %v307_v19 }
 0x25b   :  { %v3504_v24 = vpop.f32.mrb[16].mxu1  ;;  %v3506_v26 = vpop.f32.mrb[18].mxu0 }
 0x25c   :  { %v554_v33 = vpop.f32.mrb[17].mxu1  ;;  %v806_v37 = vpop.f32.mrb[19].mxu0  ;;  %957 = vmax.xlane.f32.xlu1 %v956_v27  ;;  %954 = vmax.xlane.f32.xlu0 %v953_v29  ;;  %v310_v27 = vld [vmem:[%s4208_s4 + $0x68] sm:$0xff]  ;;  %v3567_v29 = vadd.f32 %v544_v20, %v311_v5 }
 0x25d   :  { %v3565_v21 = vadd.f32 %v3478_v4, %v310_v27  ;;  %v3601_v35 = vadd.f32 %v3506_v26, %v310_v27 }
 0x25e   :  { %v908_v4 = vsel %vm865_vm2, %v3567_v29, -inf }
 0x25f   :  { %v3516_v44 = vpop.f32.mrb[18].mxu1  ;;  %v3518_v45 = vpop.f32.mrb[20].mxu0  ;;  %v905_v20 = vsel %vm865_vm2, %v3565_v21, -inf }
 0x260   :  { %v564_v53 = vpop.f32.mrb[19].mxu1  ;;  %v816_v55 = vpop.f32.mrb[21].mxu0  ;;  %897 = vmax.xlane.f32.xlu1 %v896_v49  ;;  %894 = vmax.xlane.f32.xlu0 %v893_v50  ;;  %v968_v50 = vsel %vm865_vm2, %v3546_v59, -inf }
 0x261   :  { %v3603_v36 = vadd.f32 %v816_v55, %v311_v5  ;;  %v977_v5 = vsel %vm865_vm2, %v3601_v35, -inf }
 0x263   :  { %v3534_v62 = vpop.f32.mrb[20].mxu1  ;;  %v3536_v56 = vpop.f32.mrb[22].mxu0  ;;  %v980_v27 = vsel %vm865_vm2, %v3603_v36, -inf }
 0x264   :  { %v3542_v1 = vpop.f32.mrb[21].mxu1  ;;  %v826_v51 = vpop.f32.mrb[23].mxu0  ;;  %963 = vmax.xlane.f32.xlu1 %v962_v63  ;;  %960 = vmax.xlane.f32.xlu0 %v959_v0  ;;  %v965_v63 = vsel %vm865_vm2, %v3544_v6, -inf }
 0x267   :  { %v3548_v7 = vpop.f32.mrb[22].mxu1  ;;  %v3550_v8 = vpop.f32.mrb[24].mxu0 }
 0x268   :  { %v3562_v17 = vpop.f32.mrb[23].mxu1  ;;  %v836_v19 = vpop.f32.mrb[25].mxu0  ;;  %903 = vmax.xlane.f32.xlu1 %v902_v14  ;;  %900 = vmax.xlane.f32.xlu0 %v899_v15  ;;  %v3577_v14 = vadd.f32 %v806_v37, %v309_v43  ;;  %v3592_v37 = vadd.f32 %v3488_v12, %v312_v39 }
 0x26a   :  { %v974_v43 = vsel %vm865_vm2, %v3577_v14, -inf  ;;  %v911_v12 = vsel %vm865_vm2, %v3592_v37, -inf }
 0x26b   :  { %v3569_v49 = vpop.f32.mrb[26].mxu0 }
 0x26c   :  { %v846_v0 = vpop.f32.mrb[27].mxu0  ;;  %969 = vmax.xlane.f32.xlu1 %v968_v50  ;;  %966 = vmax.xlane.f32.xlu0 %v965_v63  ;;  %v313_v50 = vld [vmem:[%s4208_s4 + $0x80] sm:$0xff]  ;;  %v971_v63 = vsel %vm865_vm2, %v3575_v38, -inf }
 0x26d   :  { %v3594_v52 = vadd.f32 %v554_v33, %v313_v50  ;;  %v314_v33 = vld [vmem:[%s4208_s4 + $0x88] sm:$0xff] }
 0x26e   :  { %v3616_v26 = vadd.f32 %v3504_v24, %v314_v33 }
 0x26f   :  { %v3579_v15 = vpop.f32.mrb[28].mxu0 }
 0x270   :  { %v856_v13 = vpop.f32.mrb[29].mxu0  ;;  %909 = vmax.xlane.f32.xlu1 %v908_v4  ;;  %906 = vmax.xlane.f32.xlu0 %v905_v20  ;;  %v914_v4 = vsel %vm865_vm2, %v3594_v52, -inf  ;;  %v315_v20 = vld [vmem:[%s4208_s4 + $0x90] sm:$0xff]  ;;  %v917_v24 = vsel %vm865_vm2, %v3616_v26, -inf }
 0x271   :  { %v3618_v55 = vadd.f32 %v564_v53, %v315_v20  ;;  %v316_v53 = vld [vmem:[%s4208_s4 + $0x98] sm:$0xff] }
 0x274   :  { %975 = vmax.xlane.f32.xlu1 %v974_v43  ;;  %972 = vmax.xlane.f32.xlu0 %v971_v63  ;;  %v3625_v43 = vadd.f32 %v3518_v45, %v312_v39  ;;  %v3627_v63 = vadd.f32 %v826_v51, %v313_v50  ;;  %v3640_v39 = vadd.f32 %v3516_v44, %v316_v53 }
 0x276   :  { %v986_v51 = vsel %vm865_vm2, %v3627_v63, -inf  ;;  %v983_v50 = vsel %vm865_vm2, %v3625_v43, -inf }
 0x278   :  { %915 = vmax.xlane.f32.xlu1 %v914_v4  ;;  %912 = vmax.xlane.f32.xlu0 %v911_v12  ;;  %v920_v4 = vsel %vm865_vm2, %v3618_v55, -inf  ;;  %v317_v12 = vld [vmem:[%s4208_s4 + $0xa0] sm:$0xff] }
 0x279   :  { %v3643_v45 = vadd.f32 %v3542_v1, %v317_v12  ;;  %v923_v1 = vsel %vm865_vm2, %v3640_v39, -inf }
 0x27b   :  { %v926_v44 = vsel %vm865_vm2, %v3643_v45, -inf }
 0x27c   :  { %981 = vmax.xlane.f32.xlu1 %v980_v27  ;;  %978 = vmax.xlane.f32.xlu0 %v977_v5  ;;  %v3650_v27 = vadd.f32 %v3536_v56, %v314_v33  ;;  %v3652_v5 = vadd.f32 %v836_v19, %v315_v20 }
 0x27e   :  { %v992_v33 = vsel %vm865_vm2, %v3652_v5, -inf  ;;  %v989_v20 = vsel %vm865_vm2, %v3650_v27, -inf }
 0x280   :  { %921 = vmax.xlane.f32.xlu1 %v920_v4  ;;  %918 = vmax.xlane.f32.xlu0 %v917_v24  ;;  %v318_v4 = vld [vmem:[%s4208_s4 + $0xa8] sm:$0xff]  ;;  %v319_v24 = vld [vmem:[%s4208_s4 + $0xb0] sm:$0xff] }
 0x281   :  { %v3665_v56 = vadd.f32 %v3534_v62, %v318_v4  ;;  %v3668_v19 = vadd.f32 %v3562_v17, %v319_v24 }
 0x283   :  { %v932_v62 = vsel %vm865_vm2, %v3668_v19, -inf  ;;  %v929_v17 = vsel %vm865_vm2, %v3665_v56, -inf }
 0x284   :  { %987 = vmax.xlane.f32.xlu1 %v986_v51  ;;  %984 = vmax.xlane.f32.xlu0 %v983_v50  ;;  %v3675_v51 = vadd.f32 %v3550_v8, %v316_v53  ;;  %v3677_v50 = vadd.f32 %v846_v0, %v317_v12  ;;  %v3696_v53 = vadd.f32 %v3569_v49, %v318_v4 }
 0x286   :  { %v998_v8 = vsel %vm865_vm2, %v3677_v50, -inf  ;;  %v995_v0 = vsel %vm865_vm2, %v3675_v51, -inf }
 0x288   :  { %927 = vmax.xlane.f32.xlu1 %v926_v44  ;;  %924 = vmax.xlane.f32.xlu0 %v923_v1  ;;  %v320_v44 = vld [vmem:[%s4208_s4 + $0xb8] sm:$0xff] }
 0x289   :  { %v3687_v1 = vadd.f32 %v3548_v7, %v320_v44 }
 0x28b   :  { %v935_v7 = vsel %vm865_vm2, %v3687_v1, -inf }
 0x28c   :  { %993 = vmax.xlane.f32.xlu1 %v992_v33  ;;  %990 = vmax.xlane.f32.xlu0 %v989_v20  ;;  %v3689_v33 = vadd.f32 %v856_v13, %v319_v24  ;;  %v3703_v13 = vadd.f32 %v3579_v15, %v320_v44  ;;  %v1001_v24 = vsel %vm865_vm2, %v3696_v53, -inf }
 0x28e   :  { %v1004_v12 = vsel %vm865_vm2, %v3689_v33, -inf  ;;  %v1007_v20 = vsel %vm865_vm2, %v3703_v13, -inf }
 0x290   :  { %933 = vmax.xlane.f32.xlu1 %v932_v62  ;;  %930 = vmax.xlane.f32.xlu0 %v929_v17 }
 0x294   :  { %999 = vmax.xlane.f32.xlu1 %v998_v8  ;;  %996 = vmax.xlane.f32.xlu0 %v995_v0 }
 0x298   :  { %1005 = vmax.xlane.f32.xlu1 %v1004_v12  ;;  %936 = vmax.xlane.f32.xlu0 %v935_v7 }
 0x29c   :  { %1002 = vmax.xlane.f32.xlu0 %v1001_v24 }
 0x2a0   :  { %1008 = vmax.xlane.f32.xlu0 %v1007_v20 }
 0x2cc   :  { %v871_v49 = vpop.xlane.xlu1 %870 }
 0x2cd   :  { %v1011_v4 = vsub.f32 %v3409_v9, %v871_v49  ;;  %v868_v62 = vpop.xlane.xlu0 %867 }
 0x2ce   :  { %v1010_v17 = vsub.f32 %v3411_v11, %v868_v62 }
 0x2cf   :  { %v1060_v8 = vmul.f32 1.442695, %v1011_v4 }
 0x2d0   :  { %v1058_v0 = vmul.f32 1.442695, %v1010_v17 }
 0x2d1   :  { %2901 = vpow2.f32 %v1060_v8  ;;  %v874_v12 = vpop.xlane.xlu1 %873  ;;  %v877_v15 = vpop.xlane.xlu0 %876 }
 0x2d2   :  { %2903 = vpow2.f32 %v1058_v0  ;;  %v1012_v44 = vsub.f32 %v3425_v18, %v874_v12  ;;  %v1013_v7 = vsub.f32 %v3423_v16, %v877_v15 }
 0x2d4   :  { %v1062_v24 = vmul.f32 1.442695, %v1012_v44  ;;  %v1064_v32 = vmul.f32 1.442695, %v1013_v7 }
 0x2d5   :  { %v880_v34 = vpop.xlane.xlu1 %879  ;;  %v943_v20 = vpop.xlane.xlu0 %942 }
 0x2d6   :  { %2905 = vpow2.f32 %v1062_v24  ;;  %v1035_v9 = vsub.f32 %v3437_v25, %v943_v20  ;;  %v1014_v0 = vsub.f32 %v3439_v28, %v880_v34 }
 0x2d7   :  { %2907 = vpow2.f32 %v1064_v32 }
 0x2d8   :  { %v1108_v49 = vmul.f32 1.442695, %v1035_v9  ;;  %v1066_v24 = vmul.f32 1.442695, %v1014_v0 }
 0x2d9   :  { %v946_v11 = vpop.xlane.xlu1 %945  ;;  %v883_v4 = vpop.xlane.xlu0 %882 }
 0x2da   :  { %v1015_v62 = vsub.f32 %v3443_v30, %v883_v4  ;;  %2909 = vpow2.f32 %v1108_v49  ;;  %v1036_v20 = vsub.f32 %v3450_v46, %v946_v11 }
 0x2db   :  { %v3715_v17 = vpop.eup %2901 }
 0x2dc   :  { %v3717_v8 = vpop.eup %2903  ;;  %v1068_v18 = vmul.f32 1.442695, %v1015_v62  ;;  %v1157_v16 = vsel %vm865_vm2, %v3715_v17, 0.0 }
 0x2dd   :  { %v886_v12 = vpop.xlane.xlu1 %885  ;;  %1158 = vadd.xlane.f32.xlu0 %v1157_v16  ;;  %v940_v25 = vpop.xlane.xlu0 %939  ;;  %v1154_v32 = vsel %vm865_vm2, %v3717_v8, 0.0 }
 0x2de   :  { %v1034_v15 = vsub.f32 %v3452_v47, %v940_v25  ;;  %1155 = vadd.xlane.f32.xlu1 %v1154_v32  ;;  %2911 = vpow2.f32 %v1068_v18  ;;  %v1110_v18 = vmul.f32 1.442695, %v1036_v20  ;;  %v1016_v46 = vsub.f32 %v3454_v48, %v886_v12 }
 0x2e0   :  { %v3725_v30 = vpop.eup %2905  ;;  %v1106_v44 = vmul.f32 1.442695, %v1034_v15  ;;  %v1070_v15 = vmul.f32 1.442695, %v1016_v46 }
 0x2e1   :  { %v3727_v7 = vpop.eup %2907  ;;  %v952_v9 = vpop.xlane.xlu1 %951  ;;  %v1160_v28 = vsel %vm865_vm2, %v3725_v30, 0.0 }
 0x2e2   :  { %v949_v34 = vpop.xlane.xlu0 %948  ;;  %1161 = vadd.xlane.f32.xlu1 %v1160_v28  ;;  %v1163_v47 = vsel %vm865_vm2, %v3727_v7, 0.0  ;;  %2913 = vpow2.f32 %v1106_v44  ;;  %v1038_v44 = vsub.f32 %v3462_v58, %v952_v9 }
 0x2e3   :  { %v1037_v49 = vsub.f32 %v3460_v57, %v949_v34  ;;  %1164 = vadd.xlane.f32.xlu0 %v1163_v47  ;;  %2915 = vpow2.f32 %v1066_v24 }
 0x2e4   :  { %v3735_v62 = vpop.eup %2909  ;;  %v1114_v28 = vmul.f32 1.442695, %v1038_v44 }
 0x2e5   :  { %v1112_v4 = vmul.f32 1.442695, %v1037_v49  ;;  %v892_v11 = vpop.xlane.xlu1 %891  ;;  %v1229_v57 = vsel %vm865_vm2, %v3735_v62, 0.0 }
 0x2e6   :  { %v889_v16 = vpop.xlane.xlu0 %888  ;;  %v1018_v49 = vsub.f32 %v3476_v3, %v892_v11 }
 0x2e7   :  { %v1017_v0 = vsub.f32 %v3474_v2, %v889_v16  ;;  %2917 = vpow2.f32 %v1112_v4  ;;  %1230 = vadd.xlane.f32.xlu0 %v1229_v57 }
 0x2e8   :  { %v3741_v32 = vpop.eup %2911  ;;  %2919 = vpow2.f32 %v1110_v18  ;;  %v1074_v16 = vmul.f32 1.442695, %v1018_v49 }
 0x2e9   :  { %v1072_v25 = vmul.f32 1.442695, %v1017_v0  ;;  %v958_v24 = vpop.xlane.xlu1 %957  ;;  %v1169_v12 = vsel %vm865_vm2, %v3741_v32, 0.0 }
 0x2ea   :  { %v955_v20 = vpop.xlane.xlu0 %954 }
 0x2eb   :  { %v1039_v48 = vsub.f32 %v3484_v10, %v955_v20  ;;  %2921 = vpow2.f32 %v1072_v25  ;;  %1170 = vadd.xlane.f32.xlu0 %v1169_v12  ;;  %v1040_v20 = vsub.f32 %v3486_v54, %v958_v24 }
 0x2ec   :  { %v3747_v34 = vpop.eup %2913  ;;  %2923 = vpow2.f32 %v1070_v15 }
 0x2ed   :  { %v1116_v2 = vmul.f32 1.442695, %v1039_v48  ;;  %v898_v47 = vpop.xlane.xlu1 %897  ;;  %v1226_v9 = vsel %vm865_vm2, %v3747_v34, 0.0  ;;  %v3753_v10 = vpop.eup %2915 }
 0x2ee   :  { %v895_v4 = vpop.xlane.xlu0 %894  ;;  %1227 = vadd.xlane.f32.xlu1 %v1226_v9  ;;  %v1166_v11 = vsel %vm865_vm2, %v3753_v10, 0.0  ;;  %v1118_v9 = vmul.f32 1.442695, %v1040_v20  ;;  %v1020_v54 = vsub.f32 %v3502_v23, %v898_v47 }
 0x2ef   :  { %v1019_v58 = vsub.f32 %v3500_v22, %v895_v4  ;;  %2925 = vpow2.f32 %v1116_v2 }
 0x2f0   :  { %2927 = vpow2.f32 %v1114_v28  ;;  %v1078_v23 = vmul.f32 1.442695, %v1020_v54 }
 0x2f1   :  { %v1076_v18 = vmul.f32 1.442695, %v1019_v58  ;;  %v3755_v46 = vpop.eup %2917  ;;  %v964_v0 = vpop.xlane.xlu1 %963 }
 0x2f2   :  { %v961_v57 = vpop.xlane.xlu0 %960  ;;  %v1235_v22 = vsel %vm865_vm2, %v3755_v46, 0.0  ;;  %v3762_v25 = vpop.eup %2919  ;;  %1167 = vadd.xlane.f32.xlu1 %v1166_v11  ;;  %v1042_v47 = vsub.f32 %v3514_v41, %v964_v0 }
 0x2f3   :  { %v1041_v3 = vsub.f32 %v3512_v40, %v961_v57  ;;  %2929 = vpow2.f32 %v1076_v18  ;;  %1236 = vadd.xlane.f32.xlu0 %v1235_v22  ;;  %v1232_v2 = vsel %vm865_vm2, %v3762_v25, 0.0 }
 0x2f4   :  { %2931 = vpow2.f32 %v1074_v16  ;;  %v1122_v41 = vmul.f32 1.442695, %v1042_v47 }
 0x2f5   :  { %v1120_v15 = vmul.f32 1.442695, %v1041_v3  ;;  %v3764_v44 = vpop.eup %2921  ;;  %v904_v48 = vpop.xlane.xlu1 %903 }
 0x2f6   :  { %v901_v12 = vpop.xlane.xlu0 %900  ;;  %v1175_v28 = vsel %vm865_vm2, %v3764_v44, 0.0  ;;  %v3772_v49 = vpop.eup %2923  ;;  %1233 = vadd.xlane.f32.xlu1 %v1232_v2  ;;  %v1022_v0 = vsub.f32 %v3532_v61, %v904_v48 }
 0x2f7   :  { %v1021_v40 = vsub.f32 %v3530_v60, %v901_v12  ;;  %2933 = vpow2.f32 %v1120_v15  ;;  %1176 = vadd.xlane.f32.xlu0 %v1175_v28  ;;  %v1172_v16 = vsel %vm865_vm2, %v3772_v49, 0.0 }
 0x2f9   :  { %v1080_v4 = vmul.f32 1.442695, %v1021_v40  ;;  %v3774_v58 = vpop.eup %2925  ;;  %v970_v24 = vpop.xlane.xlu1 %969 }
 0x2fa   :  { %v967_v18 = vpop.xlane.xlu0 %966  ;;  %v1241_v57 = vsel %vm865_vm2, %v3774_v58, 0.0  ;;  %v3782_v3 = vpop.eup %2927  ;;  %1173 = vadd.xlane.f32.xlu1 %v1172_v16  ;;  %v1044_v61 = vsub.f32 %v3546_v59, %v970_v24 }
 0x2fb   :  { %v1043_v60 = vsub.f32 %v3544_v6, %v967_v18  ;;  %2935 = vpow2.f32 %v1080_v4  ;;  %1242 = vadd.xlane.f32.xlu0 %v1241_v57  ;;  %v1238_v12 = vsel %vm865_vm2, %v3782_v3, 0.0 }
 0x2fc   :  { %2937 = vpow2.f32 %v1118_v9 }
 0x2fd   :  { %v1124_v11 = vmul.f32 1.442695, %v1043_v60  ;;  %v3784_v22 = vpop.eup %2929  ;;  %v910_v15 = vpop.xlane.xlu1 %909 }
 0x2fe   :  { %v907_v6 = vpop.xlane.xlu0 %906  ;;  %v1181_v40 = vsel %vm865_vm2, %v3784_v22, 0.0  ;;  %v3792_v2 = vpop.eup %2931  ;;  %1239 = vadd.xlane.f32.xlu1 %v1238_v12 }
 0x2ff   :  { %v1023_v20 = vsub.f32 %v3565_v21, %v907_v6  ;;  %2939 = vpow2.f32 %v1124_v11  ;;  %1182 = vadd.xlane.f32.xlu0 %v1181_v40  ;;  %v1178_v18 = vsel %vm865_vm2, %v3792_v2, 0.0  ;;  %v1082_v11 = vmul.f32 1.442695, %v1022_v0 }
 0x300   :  { %2941 = vpow2.f32 %v1078_v23  ;;  %v1126_v40 = vmul.f32 1.442695, %v1044_v61 }
 0x301   :  { %v1084_v28 = vmul.f32 1.442695, %v1023_v20  ;;  %v3794_v4 = vpop.eup %2933  ;;  %v976_v9 = vpop.xlane.xlu1 %975 }
 0x302   :  { %v973_v21 = vpop.xlane.xlu0 %972  ;;  %v1247_v60 = vsel %vm865_vm2, %v3794_v4, 0.0  ;;  %1179 = vadd.xlane.f32.xlu1 %v1178_v18 }
 0x303   :  { %v1045_v54 = vsub.f32 %v3575_v38, %v973_v21  ;;  %2943 = vpow2.f32 %v1084_v28  ;;  %1248 = vadd.xlane.f32.xlu0 %v1247_v60  ;;  %v1024_v28 = vsub.f32 %v3567_v29, %v910_v15 }
 0x304   :  { %2945 = vpow2.f32 %v1122_v41 }
 0x305   :  { %v1128_v16 = vmul.f32 1.442695, %v1045_v54  ;;  %v3802_v57 = vpop.eup %2935  ;;  %v916_v48 = vpop.xlane.xlu1 %915  ;;  %v1046_v54 = vsub.f32 %v3577_v14, %v976_v9  ;;  %v1086_v29 = vmul.f32 1.442695, %v1024_v28 }
 0x306   :  { %v913_v23 = vpop.xlane.xlu0 %912  ;;  %v1187_v47 = vsel %vm865_vm2, %v3802_v57, 0.0  ;;  %v3808_v6 = vpop.eup %2937 }
 0x307   :  { %v1025_v38 = vsub.f32 %v3592_v37, %v913_v23  ;;  %2947 = vpow2.f32 %v1128_v16  ;;  %1188 = vadd.xlane.f32.xlu1 %v1187_v47  ;;  %v1244_v37 = vsel %vm865_vm2, %v3808_v6, 0.0  ;;  %v1130_v14 = vmul.f32 1.442695, %v1046_v54 }
 0x308   :  { %2949 = vpow2.f32 %v1082_v11 }
 0x309   :  { %v1088_v20 = vmul.f32 1.442695, %v1025_v38  ;;  %v3810_v12 = vpop.eup %2939  ;;  %v982_v41 = vpop.xlane.xlu1 %981 }
 0x30a   :  { %v979_v59 = vpop.xlane.xlu0 %978  ;;  %v1253_v0 = vsel %vm865_vm2, %v3810_v12, 0.0  ;;  %v3818_v21 = vpop.eup %2941  ;;  %v1048_v9 = vsub.f32 %v3603_v36, %v982_v41 }
 0x30b   :  { %v1047_v24 = vsub.f32 %v3601_v35, %v979_v59  ;;  %2951 = vpow2.f32 %v1088_v20  ;;  %1245 = vadd.xlane.f32.xlu1 %v1244_v37  ;;  %1254 = vadd.xlane.f32.xlu0 %v1253_v0  ;;  %v1026_v35 = vsub.f32 %v3594_v52, %v916_v48  ;;  %v1184_v61 = vsel %vm865_vm2, %v3818_v21, 0.0 }
 0x30c   :  { %2953 = vpow2.f32 %v1126_v40  ;;  %v1134_v36 = vmul.f32 1.442695, %v1048_v9 }
 0x30d   :  { %v1132_v18 = vmul.f32 1.442695, %v1047_v24  ;;  %v3821_v60 = vpop.eup %2943  ;;  %v922_v15 = vpop.xlane.xlu1 %921  ;;  %v1090_v48 = vmul.f32 1.442695, %v1026_v35 }
 0x30e   :  { %v919_v16 = vpop.xlane.xlu0 %918  ;;  %v1193_v23 = vsel %vm865_vm2, %v3821_v60, 0.0  ;;  %v3829_v38 = vpop.eup %2945  ;;  %v1028_v41 = vsub.f32 %v3618_v55, %v922_v15 }
 0x30f   :  { %v1027_v11 = vsub.f32 %v3616_v26, %v919_v16  ;;  %2955 = vpow2.f32 %v1132_v18  ;;  %1185 = vadd.xlane.f32.xlu1 %v1184_v61  ;;  %1194 = vadd.xlane.f32.xlu0 %v1193_v23  ;;  %v1250_v28 = vsel %vm865_vm2, %v3829_v38, 0.0 }
 0x310   :  { %2957 = vpow2.f32 %v1086_v29  ;;  %v1094_v55 = vmul.f32 1.442695, %v1028_v41 }
 0x311   :  { %v1092_v47 = vmul.f32 1.442695, %v1027_v11  ;;  %v3832_v52 = vpop.eup %2947  ;;  %v988_v26 = vpop.xlane.xlu1 %987 }
 0x312   :  { %v985_v20 = vpop.xlane.xlu0 %984  ;;  %v1259_v59 = vsel %vm865_vm2, %v3832_v52, 0.0  ;;  %v3839_v24 = vpop.eup %2949  ;;  %v1050_v15 = vsub.f32 %v3627_v63, %v988_v26 }
 0x313   :  { %v1049_v40 = vsub.f32 %v3625_v43, %v985_v20  ;;  %2959 = vpow2.f32 %v1092_v47  ;;  %1251 = vadd.xlane.f32.xlu1 %v1250_v28  ;;  %1260 = vadd.xlane.f32.xlu0 %v1259_v59  ;;  %v1190_v29 = vsel %vm865_vm2, %v3839_v24, 0.0 }
 0x314   :  { %2961 = vpow2.f32 %v1130_v14  ;;  %v1138_v63 = vmul.f32 1.442695, %v1050_v15 }
 0x315   :  { %v3842_v37 = vpop.eup %2951  ;;  %2963 = vpow2.f32 %v1090_v48  ;;  %v1136_v0 = vmul.f32 1.442695, %v1049_v40  ;;  %v928_v43 = vpop.xlane.xlu1 %927 }
 0x316   :  { %v925_v54 = vpop.xlane.xlu0 %924  ;;  %v1199_v35 = vsel %vm865_vm2, %v3842_v37, 0.0  ;;  %v3849_v16 = vpop.eup %2953  ;;  %2965 = vpow2.f32 %v1134_v36  ;;  %v1030_v26 = vsub.f32 %v3643_v45, %v928_v43 }
 0x317   :  { %v1029_v18 = vsub.f32 %v3640_v39, %v925_v54  ;;  %1191 = vadd.xlane.f32.xlu1 %v1190_v29  ;;  %1200 = vadd.xlane.f32.xlu0 %v1199_v35  ;;  %2967 = vpow2.f32 %v1136_v0  ;;  %v1256_v9 = vsel %vm865_vm2, %v3849_v16, 0.0 }
 0x318   :  { %2969 = vpow2.f32 %v1094_v55  ;;  %v1098_v45 = vmul.f32 1.442695, %v1030_v26 }
 0x319   :  { %v3852_v11 = vpop.eup %2955  ;;  %v1096_v61 = vmul.f32 1.442695, %v1029_v18  ;;  %v994_v23 = vpop.xlane.xlu1 %993 }
 0x31a   :  { %v991_v39 = vpop.xlane.xlu0 %990  ;;  %v1265_v47 = vsel %vm865_vm2, %v3852_v11, 0.0  ;;  %v3859_v48 = vpop.eup %2957  ;;  %v1052_v43 = vsub.f32 %v3652_v5, %v994_v23 }
 0x31b   :  { %v1051_v14 = vsub.f32 %v3650_v27, %v991_v39  ;;  %1257 = vadd.xlane.f32.xlu1 %v1256_v9  ;;  %1266 = vadd.xlane.f32.xlu0 %v1265_v47  ;;  %2971 = vpow2.f32 %v1096_v61  ;;  %v1196_v41 = vsel %vm865_vm2, %v3859_v48, 0.0 }
 0x31c   :  { %2973 = vpow2.f32 %v1138_v63  ;;  %v1142_v5 = vmul.f32 1.442695, %v1052_v43 }
 0x31d   :  { %v3862_v20 = vpop.eup %2959  ;;  %v1140_v40 = vmul.f32 1.442695, %v1051_v14  ;;  %v934_v28 = vpop.xlane.xlu1 %933 }
 0x31e   :  { %v931_v27 = vpop.xlane.xlu0 %930  ;;  %v3864_v59 = vpop.eup %2961  ;;  %v1205_v0 = vsel %vm865_vm2, %v3862_v20, 0.0  ;;  %v1032_v23 = vsub.f32 %v3668_v19, %v934_v28 }
 0x31f   :  { %v1031_v36 = vsub.f32 %v3665_v56, %v931_v27  ;;  %v3871_v54 = vpop.eup %2963  ;;  %1197 = vadd.xlane.f32.xlu1 %v1196_v41  ;;  %1206 = vadd.xlane.f32.xlu0 %v1205_v0  ;;  %2975 = vpow2.f32 %v1140_v40  ;;  %v1262_v15 = vsel %vm865_vm2, %v3864_v59, 0.0 }
 0x320   :  { %v3874_v35 = vpop.eup %2965  ;;  %v1202_v55 = vsel %vm865_vm2, %v3871_v54, 0.0  ;;  %2977 = vpow2.f32 %v1098_v45  ;;  %v1102_v27 = vmul.f32 1.442695, %v1032_v23 }
 0x321   :  { %v1100_v18 = vmul.f32 1.442695, %v1031_v36  ;;  %v3881_v61 = vpop.eup %2967  ;;  %v1000_v39 = vpop.xlane.xlu1 %999  ;;  %v1268_v63 = vsel %vm865_vm2, %v3874_v35, 0.0 }
 0x322   :  { %v997_v29 = vpop.xlane.xlu0 %996  ;;  %v3884_v47 = vpop.eup %2969  ;;  %v1271_v26 = vsel %vm865_vm2, %v3881_v61, 0.0  ;;  %v1054_v19 = vsub.f32 %v3677_v50, %v1000_v39 }
 0x323   :  { %v1053_v56 = vsub.f32 %v3675_v51, %v997_v29  ;;  %1203 = vadd.xlane.f32.xlu1 %v1202_v55  ;;  %1263 = vadd.xlane.f32.xlu0 %v1262_v15  ;;  %2979 = vpow2.f32 %v1100_v18  ;;  %v1208_v45 = vsel %vm865_vm2, %v3884_v47, 0.0 }
 0x324   :  { %2981 = vpow2.f32 %v1142_v5  ;;  %v1146_v50 = vmul.f32 1.442695, %v1054_v19 }
 0x325   :  { %v1144_v14 = vmul.f32 1.442695, %v1053_v56  ;;  %v3891_v40 = vpop.eup %2971  ;;  %v1006_v28 = vpop.xlane.xlu1 %1005 }
 0x326   :  { %v937_v9 = vpop.xlane.xlu0 %936  ;;  %v3894_v0 = vpop.eup %2973  ;;  %v1211_v43 = vsel %vm865_vm2, %v3891_v40, 0.0  ;;  %v1056_v29 = vsub.f32 %v3689_v33, %v1006_v28 }
 0x327   :  { %v1033_v51 = vsub.f32 %v3687_v1, %v937_v9  ;;  %1269 = vadd.xlane.f32.xlu1 %v1268_v63  ;;  %1272 = vadd.xlane.f32.xlu0 %v1271_v26  ;;  %2983 = vpow2.f32 %v1144_v14  ;;  %v1274_v39 = vsel %vm865_vm2, %v3894_v0, 0.0 }
 0x328   :  { %2985 = vpow2.f32 %v1102_v27  ;;  %v1150_v14 = vmul.f32 1.442695, %v1056_v29 }
 0x329   :  { %v1104_v36 = vmul.f32 1.442695, %v1033_v51  ;;  %v3901_v18 = vpop.eup %2975 }
 0x32a   :  { %v1003_v41 = vpop.xlane.xlu0 %1002  ;;  %v3904_v15 = vpop.eup %2977  ;;  %v1277_v5 = vsel %vm865_vm2, %v3901_v18, 0.0 }
 0x32b   :  { %v1055_v1 = vsub.f32 %v3696_v53, %v1003_v41  ;;  %1209 = vadd.xlane.f32.xlu1 %v1208_v45  ;;  %1212 = vadd.xlane.f32.xlu0 %v1211_v43  ;;  %2987 = vpow2.f32 %v1104_v36  ;;  %v1214_v51 = vsel %vm865_vm2, %v3904_v15, 0.0 }
 0x32c   :  { %2989 = vpow2.f32 %v1146_v50 }
 0x32d   :  { %v1148_v56 = vmul.f32 1.442695, %v1055_v1  ;;  %v3911_v23 = vpop.eup %2979 }
 0x32e   :  { %v1009_v55 = vpop.xlane.xlu0 %1008  ;;  %v3913_v9 = vpop.eup %2981 }
 0x32f   :  { %v1057_v53 = vsub.f32 %v3703_v13, %v1009_v55  ;;  %1275 = vadd.xlane.f32.xlu1 %v1274_v39  ;;  %1278 = vadd.xlane.f32.xlu0 %v1277_v5  ;;  %2991 = vpow2.f32 %v1148_v56  ;;  %v1217_v13 = vsel %vm865_vm2, %v3911_v23, 0.0  ;;  %v1280_v27 = vsel %vm865_vm2, %v3913_v9, 0.0 }
 0x330   :  { %2993 = vpow2.f32 %v1150_v14 }
 0x331   :  { %v1152_v33 = vmul.f32 1.442695, %v1057_v53  ;;  %v3919_v63 = vpop.eup %2983 }
 0x332   :  { %v3921_v26 = vpop.eup %2985  ;;  %v1283_v19 = vsel %vm865_vm2, %v3919_v63, 0.0 }
 0x333   :  { %1215 = vadd.xlane.f32.xlu1 %v1214_v51  ;;  %1218 = vadd.xlane.f32.xlu0 %v1217_v13  ;;  %2995 = vpow2.f32 %v1152_v33  ;;  %v1220_v41 = vsel %vm865_vm2, %v3921_v26, 0.0 }
 0x335   :  { %v3927_v28 = vpop.eup %2987 }
 0x336   :  { %v3929_v36 = vpop.eup %2989  ;;  %v1223_v1 = vsel %vm865_vm2, %v3927_v28, 0.0 }
 0x337   :  { %1281 = vadd.xlane.f32.xlu1 %v1280_v27  ;;  %1284 = vadd.xlane.f32.xlu0 %v1283_v19  ;;  %v1286_v50 = vsel %vm865_vm2, %v3929_v36, 0.0 }
 0x339   :  { %v3935_v45 = vpop.eup %2991 }
 0x33a   :  { %v3937_v43 = vpop.eup %2993  ;;  %v1289_v29 = vsel %vm865_vm2, %v3935_v45, 0.0 }
 0x33b   :  { %1221 = vadd.xlane.f32.xlu1 %v1220_v41  ;;  %1224 = vadd.xlane.f32.xlu0 %v1223_v1  ;;  %v1292_v55 = vsel %vm865_vm2, %v3937_v43, 0.0 }
 0x33d   :  { %v3943_v56 = vpop.eup %2995 }
 0x33e   :  { %v1295_v53 = vsel %vm865_vm2, %v3943_v56, 0.0 }
 0x33f   :  { %1287 = vadd.xlane.f32.xlu1 %v1286_v50  ;;  %1290 = vadd.xlane.f32.xlu0 %v1289_v29 }
 0x343   :  { %1293 = vadd.xlane.f32.xlu1 %v1292_v55  ;;  %1296 = vadd.xlane.f32.xlu0 %v1295_v53 }
 0x36a   :  { %v1159_v39 = vpop.xlane.xlu0 %1158 }
 0x36b   :  { %2997 = vrcp.f32 %v1159_v39  ;;  %v1156_v5 = vpop.xlane.xlu1 %1155 }
 0x36c   :  { %2999 = vrcp.f32 %v1156_v5 }
 0x36f   :  { %v1162_v14 = vpop.xlane.xlu1 %1161 }
 0x370   :  { %3001 = vrcp.f32 %v1162_v14  ;;  %v1165_v33 = vpop.xlane.xlu0 %1164 }
 0x371   :  { %3003 = vrcp.f32 %v1165_v33 }
 0x374   :  { %v1231_v27 = vpop.xlane.xlu0 %1230 }
 0x375   :  { %v2998_v51 = vpop.eup %2997  ;;  %3005 = vrcp.f32 %v1231_v27 }
 0x376   :  { %v3000_v13 = vpop.eup %2999  ;;  %v1301_v41 = vmul.f32 %v2998_v51, %v3715_v17 }
 0x377   :  { %v1299_v19 = vmul.f32 %v3000_v13, %v3717_v8 }
 0x378   :  { %v1171_v55 = vpop.xlane.xlu0 %1170 }
 0x379   :  { %2707 = vmatprep.mubr.msk.f32.mxu1 %vm865_vm2, %v1299_v19 }
 0x37a   :  { %v3002_v1 = vpop.eup %3001  ;;  %2708 = vmatmul.mubr.msk.f32.vlgmr.msra.gmra.mrb[24].mxu1 %vm865_vm2, %v1301_v41 }
 0x37b   :  { %v3004_v50 = vpop.eup %3003  ;;  %v1303_v29 = vmul.f32 %v3002_v1, %v3725_v30  ;;  %v1228_v53 = vpop.xlane.xlu1 %1227 }
 0x37c   :  { %v1305_v39 = vmul.f32 %v3004_v50, %v3727_v7  ;;  %3007 = vrcp.f32 %v1228_v53 }
 0x37d   :  { %2710 = vmatprep.mubr.msk.f32.mxu1 %vm865_vm2, %v1303_v29  ;;  %3009 = vrcp.f32 %v1171_v55 }
 0x37e   :  { %2711 = vmatmul.mubr.msk.f32.gmra.mrb[26].mxu1 %vm865_vm2, %v1305_v39 }
 0x37f   :  { %v1168_v17 = vpop.xlane.xlu1 %1167  ;;  %v3006_v33 = vpop.eup %3005 }
 0x380   :  { %v1237_v8 = vpop.xlane.xlu0 %1236  ;;  %3011 = vrcp.f32 %v1168_v17  ;;  %v1349_v27 = vmul.f32 %v3006_v33, %v3735_v62 }
 0x381   :  { %3013 = vrcp.f32 %v1237_v8 }
 0x383   :  { %v1234_v5 = vpop.xlane.xlu1 %1233 }
 0x384   :  { %v1177_v14 = vpop.xlane.xlu0 %1176  ;;  %3015 = vrcp.f32 %v1234_v5 }
 0x385   :  { %3017 = vrcp.f32 %v1177_v14 }
 0x386   :  { %v3008_v30 = vpop.eup %3007 }
 0x387   :  { %v1174_v51 = vpop.xlane.xlu1 %1173  ;;  %v1347_v7 = vmul.f32 %v3008_v30, %v3747_v34  ;;  %v3010_v19 = vpop.eup %3009 }
 0x388   :  { %v1243_v13 = vpop.xlane.xlu0 %1242  ;;  %3019 = vrcp.f32 %v1174_v51  ;;  %v1309_v55 = vmul.f32 %v3010_v19, %v3741_v32 }
 0x389   :  { %2749 = vmatprep.mubr.msk.f32.mxu0 %vm865_vm2, %v1347_v7  ;;  %3021 = vrcp.f32 %v1243_v13 }
 0x38a   :  { %v3012_v41 = vpop.eup %3011  ;;  %2750 = vmatmul.mubr.msk.f32.vlgmr.msra.gmra.mrb[30].mxu0 %vm865_vm2, %v1349_v27 }
 0x38b   :  { %v1240_v1 = vpop.xlane.xlu1 %1239  ;;  %v1307_v50 = vmul.f32 %v3012_v41, %v3753_v10  ;;  %v3014_v53 = vpop.eup %3013 }
 0x38c   :  { %3023 = vrcp.f32 %v1240_v1  ;;  %v1183_v29 = vpop.xlane.xlu0 %1182  ;;  %v1353_v17 = vmul.f32 %v3014_v53, %v3755_v46 }
 0x38d   :  { %2713 = vmatprep.mubr.msk.f32.mxu1 %vm865_vm2, %v1307_v50  ;;  %3025 = vrcp.f32 %v1183_v29 }
 0x38e   :  { %v3016_v34 = vpop.eup %3015  ;;  %2714 = vmatmul.mubr.msk.f32.gmra.mrb[28].mxu1 %vm865_vm2, %v1309_v55 }
 0x38f   :  { %v1180_v62 = vpop.xlane.xlu1 %1179  ;;  %v1351_v39 = vmul.f32 %v3016_v34, %v3762_v25  ;;  %v3018_v8 = vpop.eup %3017 }
 0x390   :  { %3027 = vrcp.f32 %v1180_v62  ;;  %v1249_v32 = vpop.xlane.xlu0 %1248  ;;  %v1313_v33 = vmul.f32 %v3018_v8, %v3764_v44 }
 0x391   :  { %2752 = vmatprep.mubr.msk.f32.mxu0 %vm865_vm2, %v1351_v39  ;;  %3029 = vrcp.f32 %v1249_v32 }
 0x392   :  { %v3020_v10 = vpop.eup %3019  ;;  %2753 = vmatmul.mubr.msk.f32.gmra.mrb[32].mxu0 %vm865_vm2, %v1353_v17 }
 0x393   :  { %v1311_v14 = vmul.f32 %v3020_v10, %v3772_v49  ;;  %v3022_v30 = vpop.eup %3021 }
 0x394   :  { %v1189_v5 = vpop.xlane.xlu1 %1188  ;;  %v1357_v7 = vmul.f32 %v3022_v30, %v3774_v58 }
 0x395   :  { %2716 = vmatprep.mubr.msk.f32.mxu1 %vm865_vm2, %v1311_v14 }
 0x396   :  { %v3024_v51 = vpop.eup %3023  ;;  %2717 = vmatmul.mubr.msk.f32.gmra.mrb[30].mxu1 %vm865_vm2, %v1313_v33 }
 0x397   :  { %v1355_v13 = vmul.f32 %v3024_v51, %v3782_v3  ;;  %v3026_v27 = vpop.eup %3025 }
 0x398   :  { %v1246_v46 = vpop.xlane.xlu1 %1245  ;;  %v1255_v25 = vpop.xlane.xlu0 %1254  ;;  %v1317_v1 = vmul.f32 %v3026_v27, %v3784_v22 }
 0x399   :  { %3031 = vrcp.f32 %v1246_v46  ;;  %2755 = vmatprep.mubr.msk.f32.mxu0 %vm865_vm2, %v1355_v13 }
 0x39a   :  { %v3028_v49 = vpop.eup %3027  ;;  %2756 = vmatmul.mubr.msk.f32.gmra.mrb[34].mxu0 %vm865_vm2, %v1357_v7  ;;  %3033 = vrcp.f32 %v1189_v5 }
 0x39b   :  { %v1315_v41 = vmul.f32 %v3028_v49, %v3792_v2  ;;  %v3030_v50 = vpop.eup %3029 }
 0x39c   :  { %v1186_v44 = vpop.xlane.xlu1 %1185  ;;  %v1195_v19 = vpop.xlane.xlu0 %1194  ;;  %v1361_v2 = vmul.f32 %v3030_v50, %v3794_v4 }
 0x39d   :  { %3035 = vrcp.f32 %v1186_v44  ;;  %2719 = vmatprep.mubr.msk.f32.mxu1 %vm865_vm2, %v1315_v41 }
 0x39e   :  { %2720 = vmatmul.mubr.msk.f32.gmra.mrb[32].mxu1 %vm865_vm2, %v1317_v1  ;;  %3037 = vrcp.f32 %v1255_v25 }
 0x3a0   :  { %v1252_v58 = vpop.xlane.xlu1 %1251  ;;  %v1261_v3 = vpop.xlane.xlu0 %1260 }
 0x3a1   :  { %3039 = vrcp.f32 %v1252_v58 }
 0x3a2   :  { %3041 = vrcp.f32 %v1195_v19 }
 0x3a3   :  { %v3032_v29 = vpop.eup %3031 }
 0x3a4   :  { %v1192_v55 = vpop.xlane.xlu1 %1191  ;;  %v1201_v53 = vpop.xlane.xlu0 %1200  ;;  %v1359_v34 = vmul.f32 %v3032_v29, %v3808_v6 }
 0x3a5   :  { %3043 = vrcp.f32 %v1192_v55  ;;  %v3034_v62 = vpop.eup %3033 }
 0x3a6   :  { %2758 = vmatprep.mubr.msk.f32.mxu0 %vm865_vm2, %v1359_v34  ;;  %3045 = vrcp.f32 %v1261_v3  ;;  %v1321_v10 = vmul.f32 %v3034_v62, %v3802_v57 }
 0x3a7   :  { %v3036_v22 = vpop.eup %3035  ;;  %2759 = vmatmul.mubr.msk.f32.gmra.mrb[36].mxu0 %vm865_vm2, %v1361_v2 }
 0x3a8   :  { %v1258_v39 = vpop.xlane.xlu1 %1257  ;;  %v1267_v17 = vpop.xlane.xlu0 %1266  ;;  %v1319_v8 = vmul.f32 %v3036_v22, %v3818_v21 }
 0x3a9   :  { %3047 = vrcp.f32 %v1258_v39  ;;  %v3038_v32 = vpop.eup %3037 }
 0x3aa   :  { %2722 = vmatprep.mubr.msk.f32.mxu1 %vm865_vm2, %v1319_v8  ;;  %3049 = vrcp.f32 %v1201_v53  ;;  %v1365_v33 = vmul.f32 %v3038_v32, %v3810_v12 }
 0x3ab   :  { %v3040_v6 = vpop.eup %3039  ;;  %2723 = vmatmul.mubr.msk.f32.gmra.mrb[34].mxu1 %vm865_vm2, %v1321_v10 }
 0x3ac   :  { %v1198_v4 = vpop.xlane.xlu1 %1197  ;;  %v1207_v5 = vpop.xlane.xlu0 %1206  ;;  %v1363_v14 = vmul.f32 %v3040_v6, %v3829_v38 }
 0x3ad   :  { %3051 = vrcp.f32 %v1198_v4  ;;  %v3042_v30 = vpop.eup %3041 }
 0x3ae   :  { %2761 = vmatprep.mubr.msk.f32.mxu0 %vm865_vm2, %v1363_v14  ;;  %3053 = vrcp.f32 %v1267_v17  ;;  %v1325_v25 = vmul.f32 %v3042_v30, %v3821_v60 }
 0x3af   :  { %v3044_v21 = vpop.eup %3043  ;;  %2762 = vmatmul.mubr.msk.f32.gmra.mrb[38].mxu0 %vm865_vm2, %v1365_v33  ;;  %3055 = vrcp.f32 %v1207_v5 }
 0x3b0   :  { %v1204_v57 = vpop.xlane.xlu1 %1203  ;;  %v1264_v51 = vpop.xlane.xlu0 %1263  ;;  %v1323_v46 = vmul.f32 %v3044_v21, %v3839_v24 }
 0x3b1   :  { %3057 = vrcp.f32 %v1204_v57  ;;  %v3046_v13 = vpop.eup %3045 }
 0x3b2   :  { %3059 = vrcp.f32 %v1264_v51  ;;  %2725 = vmatprep.mubr.msk.f32.mxu1 %vm865_vm2, %v1323_v46  ;;  %v1369_v49 = vmul.f32 %v3046_v13, %v3832_v52 }
 0x3b3   :  { %v3048_v12 = vpop.eup %3047  ;;  %2726 = vmatmul.mubr.msk.f32.gmra.mrb[36].mxu1 %vm865_vm2, %v1325_v25 }
 0x3b4   :  { %v1270_v38 = vpop.xlane.xlu1 %1269  ;;  %v1273_v7 = vpop.xlane.xlu0 %1272  ;;  %v1367_v27 = vmul.f32 %v3048_v12, %v3849_v16 }
 0x3b5   :  { %3061 = vrcp.f32 %v1270_v38  ;;  %v3050_v44 = vpop.eup %3049 }
 0x3b6   :  { %3063 = vrcp.f32 %v1273_v7  ;;  %2764 = vmatprep.mubr.msk.f32.mxu0 %vm865_vm2, %v1367_v27  ;;  %v1329_v58 = vmul.f32 %v3050_v44, %v3842_v37 }
 0x3b7   :  { %v3052_v24 = vpop.eup %3051  ;;  %2765 = vmatmul.mubr.msk.f32.gmra.mrb[40].mxu0 %vm865_vm2, %v1369_v49 }
 0x3b8   :  { %v1210_v60 = vpop.xlane.xlu1 %1209  ;;  %v1213_v19 = vpop.xlane.xlu0 %1212  ;;  %v1327_v41 = vmul.f32 %v3052_v24, %v3859_v48 }
 0x3b9   :  { %v3054_v1 = vpop.eup %3053  ;;  %3065 = vrcp.f32 %v1210_v60  ;;  %v2068_v60 = vld [vmem:[%s4209_s5 + $0x20] sm:$0xff] }
 0x3ba   :  { %v3056_v3 = vpop.eup %3055  ;;  %3067 = vrcp.f32 %v1213_v19  ;;  %2728 = vmatprep.mubr.msk.f32.mxu1 %vm865_vm2, %v1327_v41  ;;  %v1373_v37 = vmul.f32 %v3054_v1, %v3852_v11  ;;  %v2069_v19 = vld [vmem:[%s4209_s5 + $0x28] sm:$0xff]  ;;  %v2070_v1 = vld [vmem:[%s4209_s5 + $0x30] sm:$0xff] }
 0x3bb   :  { %v3058_v52 = vpop.eup %3057  ;;  %2729 = vmatmul.mubr.msk.f32.gmra.mrb[38].mxu1 %vm865_vm2, %v1329_v58  ;;  %v1333_v48 = vmul.f32 %v3056_v3, %v3862_v20  ;;  %v2846_v41 = vpack.c.bf16 %v2069_v19, %v2068_v60  ;;  %v2071_v58 = vld [vmem:[%s4209_s5 + $0x38] sm:$0xff] }
 0x3bc   :  { %v3060_v16 = vpop.eup %3059  ;;  %v1276_v50 = vpop.xlane.xlu1 %1275  ;;  %v1331_v55 = vmul.f32 %v3058_v52, %v3871_v54  ;;  %v2850_v3 = vpack.c.bf16 %v2071_v58, %v2070_v1  ;;  %v2072_v52 = vld [vmem:[%s4209_s5 + $0x40] sm:$0xff] }
 0x3bd   :  { %v1279_v29 = vpop.xlane.xlu0 %1278  ;;  %3069 = vrcp.f32 %v1276_v50  ;;  %v1371_v53 = vmul.f32 %v3060_v16, %v3864_v59  ;;  %2847 = vmatprep.subr.bf16.mxu0 %v2846_v41  ;;  %v2073_v16 = vld [vmem:[%s4209_s5 + $0x48] sm:$0xff] }
 0x3be   :  { %3071 = vrcp.f32 %v1279_v29  ;;  %2731 = vmatprep.mubr.msk.f32.mxu1 %vm865_vm2, %v1331_v55  ;;  %2849 = vmatpush3.bf16.msra.mxu0 %v2846_v41  ;;  %v4075_v50 = vpack.c.bf16 %v2073_v16, %v2072_v52 }
 0x3bf   :  { %v3062_v34 = vpop.eup %3061  ;;  %2767 = vmatprep.mubr.msk.f32.mxu0 %vm865_vm2, %v1371_v53  ;;  %2732 = vmatmul.mubr.msk.f32.gmra.mrb[40].mxu1 %vm865_vm2, %v1333_v48 }
 0x3c0   :  { %v3064_v2 = vpop.eup %3063  ;;  %2768 = vmatmul.mubr.msk.f32.gmra.mrb[42].mxu0 %vm865_vm2, %v1373_v37  ;;  %v1216_v62 = vpop.xlane.xlu1 %1215  ;;  %v1375_v22 = vmul.f32 %v3062_v34, %v3874_v35  ;;  %2851 = vmatprep.subr.bf16.mxu0 %v2850_v3 }
 0x3c1   :  { %v1219_v54 = vpop.xlane.xlu0 %1218  ;;  %3073 = vrcp.f32 %v1216_v62  ;;  %v1377_v20 = vmul.f32 %v3064_v2, %v3881_v61 }
 0x3c2   :  { %3075 = vrcp.f32 %v1219_v54  ;;  %2770 = vmatprep.mubr.msk.f32.mxu0 %vm865_vm2, %v1375_v22  ;;  %2853 = vmatpush3.bf16.msra.mxu0 %v2850_v3  ;;  %v4232_v22 = vld [vmem:[#allocation6_spill] sm:$0xff] }
 0x3c3   :  { %v3066_v59 = vpop.eup %3065 }
 0x3c4   :  { %v3068_v11 = vpop.eup %3067  ;;  %2771 = vmatmul.mubr.msk.f32.gmra.mrb[44].mxu0 %vm865_vm2, %v1377_v20  ;;  %v1282_v39 = vpop.xlane.xlu1 %1281  ;;  %v1335_v8 = vmul.f32 %v3066_v59, %v3884_v47  ;;  %v4233_v59 = vld [vmem:[#allocation5_spill] sm:$0xff] }
 0x3c5   :  { %v1285_v17 = vpop.xlane.xlu0 %1284  ;;  %3077 = vrcp.f32 %v1282_v39  ;;  %v1337_v10 = vmul.f32 %v3068_v11, %v3891_v40 }
 0x3c6   :  { %3079 = vrcp.f32 %v1285_v17  ;;  %2734 = vmatprep.mubr.msk.f32.mxu1 %vm865_vm2, %v1335_v8 }
 0x3c7   :  { %v3070_v35 = vpop.eup %3069  ;;  %2735 = vmatmul.mubr.msk.f32.gmra.mrb[42].mxu1 %vm865_vm2, %v1337_v10 }
 0x3c8   :  { %v3072_v61 = vpop.eup %3071  ;;  %v1222_v32 = vpop.xlane.xlu1 %1221  ;;  %v1379_v4 = vmul.f32 %v3070_v35, %v3894_v0 }
 0x3c9   :  { %v1225_v6 = vpop.xlane.xlu0 %1224  ;;  %3081 = vrcp.f32 %v1222_v32  ;;  %v1381_v5 = vmul.f32 %v3072_v61, %v3901_v18 }
 0x3ca   :  { %3083 = vrcp.f32 %v1225_v6  ;;  %2773 = vmatprep.mubr.msk.f32.mxu0 %vm865_vm2, %v1379_v4 }
 0x3cb   :  { %v3074_v47 = vpop.eup %3073  ;;  %2774 = vmatmul.mubr.msk.f32.gmra.mrb[46].mxu0 %vm865_vm2, %v1381_v5 }
 0x3cc   :  { %v3076_v40 = vpop.eup %3075  ;;  %v1288_v14 = vpop.xlane.xlu1 %1287  ;;  %v1339_v30 = vmul.f32 %v3074_v47, %v3904_v15 }
 0x3cd   :  { %v1291_v33 = vpop.xlane.xlu0 %1290  ;;  %3085 = vrcp.f32 %v1288_v14  ;;  %v1341_v21 = vmul.f32 %v3076_v40, %v3911_v23 }
 0x3ce   :  { %3087 = vrcp.f32 %v1291_v33  ;;  %2737 = vmatprep.mubr.msk.f32.mxu1 %vm865_vm2, %v1339_v30  ;;  %v4234_v33 = vld [vmem:[#allocation8_spill] sm:$0xff] }
 0x3cf   :  { %v3078_v0 = vpop.eup %3077  ;;  %2738 = vmatmul.mubr.msk.f32.gmra.mrb[44].mxu1 %vm865_vm2, %v1341_v21  ;;  %v4235_v21 = vld [vmem:[#allocation7_spill] sm:$0xff] }
 0x3d0   :  { %v3080_v18 = vpop.eup %3079  ;;  %v1294_v57 = vpop.xlane.xlu1 %1293  ;;  %v1383_v46 = vmul.f32 %v3078_v0, %v3913_v9 }
 0x3d1   :  { %v1297_v51 = vpop.xlane.xlu0 %1296  ;;  %3089 = vrcp.f32 %v1294_v57  ;;  %v1385_v25 = vmul.f32 %v3080_v18, %v3919_v63 }
 0x3d2   :  { %3091 = vrcp.f32 %v1297_v51  ;;  %2776 = vmatprep.mubr.msk.f32.mxu0 %vm865_vm2, %v1383_v46 }
 0x3d3   :  { %v3082_v15 = vpop.eup %3081  ;;  %2777 = vmatmul.mubr.msk.f32.gmra.mrb[48].mxu0 %vm865_vm2, %v1385_v25 }
 0x3d4   :  { %v3084_v23 = vpop.eup %3083  ;;  %v1343_v13 = vmul.f32 %v3082_v15, %v3921_v26 }
 0x3d5   :  { %v1345_v12 = vmul.f32 %v3084_v23, %v3927_v28 }
 0x3d6   :  { %2740 = vmatprep.mubr.msk.f32.mxu1 %vm865_vm2, %v1343_v13 }
 0x3d7   :  { %v3086_v38 = vpop.eup %3085  ;;  %2741 = vmatmul.mubr.msk.f32.gmra.mrb[46].mxu1 %vm865_vm2, %v1345_v12 }
 0x3d8   :  { %v3088_v9 = vpop.eup %3087  ;;  %v1387_v7 = vmul.f32 %v3086_v38, %v3929_v36  ;;  %v2064_v36 = vld [vmem:[%s4209_s5] sm:$0xff] }
 0x3d9   :  { %v1389_v63 = vmul.f32 %v3088_v9, %v3935_v45  ;;  %v2065_v45 = vld [vmem:[%s4209_s5 + $0x8] sm:$0xff] }
 0x3da   :  { %2779 = vmatprep.mubr.msk.f32.mxu0 %vm865_vm2, %v1387_v7  ;;  %v2854_v44 = vpack.c.bf16 %v2065_v45, %v2064_v36 }
 0x3db   :  { %v3090_v27 = vpop.eup %3089  ;;  %2780 = vmatmul.mubr.msk.f32.gmra.mrb[50].mxu0 %vm865_vm2, %v1389_v63 }
 0x3dc   :  { %v3092_v49 = vpop.eup %3091  ;;  %v1391_v26 = vmul.f32 %v3090_v27, %v3937_v43  ;;  %2855 = vmatprep.subr.bf16.mxu1 %v2854_v44  ;;  %v2066_v43 = vld [vmem:[%s4209_s5 + $0x10] sm:$0xff]  ;;  %v4236_v27 = vld [vmem:[#allocation10_spill] sm:$0xff] }
 0x3dd   :  { %v1393_v28 = vmul.f32 %v3092_v49, %v3943_v56  ;;  %2857 = vmatpush3.bf16.msra.mxu1 %v2854_v44  ;;  %v2067_v56 = vld [vmem:[%s4209_s5 + $0x18] sm:$0xff] }
 0x3de   :  { %2782 = vmatprep.mubr.msk.f32.mxu0 %vm865_vm2, %v1391_v26  ;;  %v2858_v24 = vpack.c.bf16 %v2067_v56, %v2066_v43  ;;  %v4237_v26 = vld [vmem:[#allocation9_spill] sm:$0xff] }
 0x3df   :  { %2783 = vmatmul.mubr.msk.f32.gmra.mrb[52].mxu0 %vm865_vm2, %v1393_v28 }
 0x3e0   :  { %2859 = vmatprep.subr.bf16.mxu1 %v2858_v24 }
 0x3e1   :  { %2861 = vmatpush3.bf16.msra.mxu1 %v2858_v24 }
 0x3e2   :  { %2863 = vmatprep.subr.bf16.mxu1 %v4075_v50 }
 0x44d   :  { %v2709_v29 = vpop.f32.mrb[24].mxu1 }
 0x44e   :  { %v1927_v55 = vmul.f32 %v2709_v29, %v3202_v31  ;;  %v1541_v53 = vpop.f32.mrb[25].mxu1 }
 0x44f   :  { %v1926_v48 = vmul.f32 %v1541_v53, %v3219_v42 }
 0x450   :  { %v1975_v37 = vsel %vm44_vm0, %v1927_v55, 0.0 }
 0x451   :  { %v1974_v34 = vsel %vm44_vm0, %v1926_v48, 0.0  ;;  %v2712_v2 = vpop.f32.mrb[26].mxu1 }
 0x452   :  { %v1976_v62 = vadd.f32 %v1975_v37, %v1974_v34  ;;  %v1551_v54 = vpop.f32.mrb[27].mxu1  ;;  %v1929_v20 = vmul.f32 %v2712_v2, %v4232_v22 }
 0x453   :  { %v1928_v11 = vmul.f32 %v1551_v54, %v4233_v59 }
 0x454   :  { %v1979_v8 = vsel %vm44_vm0, %v1929_v20, 0.0 }
 0x455   :  { %v1977_v39 = vsel %vm44_vm0, %v1928_v11, 0.0 }
 0x456   :  { %v1978_v17 = vadd.f32 %v1977_v39, %v1976_v62 }
 0x458   :  { %v1980_v10 = vadd.f32 %v1979_v8, %v1978_v17  ;;  %v2074_v17 = vld [vmem:[%s4209_s5 + $0x50] sm:$0xff]  ;;  %v2075_v8 = vld [vmem:[%s4209_s5 + $0x58] sm:$0xff] }
 0x45d   :  { %v2751_v35 = vpop.f32.mrb[30].mxu0 }
 0x45e   :  { %v1951_v61 = vmul.f32 %v2751_v35, %v3202_v31  ;;  %v1807_v32 = vpop.f32.mrb[31].mxu0 }
 0x45f   :  { %v1950_v6 = vmul.f32 %v1807_v32, %v3219_v42 }
 0x460   :  { %v2020_v4 = vsel %vm44_vm0, %v1951_v61, 0.0 }
 0x461   :  { %v2019_v5 = vsel %vm44_vm0, %v1950_v6, 0.0  ;;  %v2715_v47 = vpop.f32.mrb[28].mxu1 }
 0x462   :  { %v2021_v40 = vadd.f32 %v2020_v4, %v2019_v5  ;;  %v1561_v14 = vpop.f32.mrb[29].mxu1  ;;  %v1931_v30 = vmul.f32 %v2715_v47, %v4234_v33  ;;  %v2866_v5 = vpack.c.bf16 %v2075_v8, %v2074_v17 }
 0x463   :  { %v1930_v0 = vmul.f32 %v1561_v14, %v4235_v21 }
 0x464   :  { %v1983_v25 = vsel %vm44_vm0, %v1931_v30, 0.0 }
 0x465   :  { %v1981_v18 = vsel %vm44_vm0, %v1930_v0, 0.0  ;;  %v2754_v57 = vpop.f32.mrb[32].mxu0 }
 0x466   :  { %v1982_v51 = vadd.f32 %v1981_v18, %v1980_v10  ;;  %v1817_v46 = vpop.f32.mrb[33].mxu0  ;;  %v1953_v15 = vmul.f32 %v2754_v57, %v4232_v22 }
 0x467   :  { %v1952_v23 = vmul.f32 %v1817_v46, %v4233_v59 }
 0x468   :  { %v1984_v13 = vadd.f32 %v1983_v25, %v1982_v51  ;;  %v2024_v63 = vsel %vm44_vm0, %v1953_v15, 0.0 }
 0x469   :  { %v2022_v12 = vsel %vm44_vm0, %v1952_v23, 0.0  ;;  %v2718_v38 = vpop.f32.mrb[30].mxu1 }
 0x46a   :  { %v2023_v9 = vadd.f32 %v2022_v12, %v2021_v40  ;;  %v1571_v7 = vpop.f32.mrb[31].mxu1  ;;  %v1933_v49 = vmul.f32 %v2718_v38, %v4236_v27 }
 0x46b   :  { %v1932_v28 = vmul.f32 %v1571_v7, %v4237_v26 }
 0x46c   :  { %v2025_v36 = vadd.f32 %v2024_v63, %v2023_v9  ;;  %v1987_v24 = vsel %vm44_vm0, %v1933_v49, 0.0 }
 0x46d   :  { %v1985_v45 = vsel %vm44_vm0, %v1932_v28, 0.0  ;;  %v2757_v44 = vpop.f32.mrb[34].mxu0 }
 0x46e   :  { %v1986_v43 = vadd.f32 %v1985_v45, %v1984_v13  ;;  %v1827_v56 = vpop.f32.mrb[35].mxu0  ;;  %v1955_v60 = vmul.f32 %v2757_v44, %v4234_v33 }
 0x46f   :  { %v1954_v19 = vmul.f32 %v1827_v56, %v4235_v21 }
 0x470   :  { %v1988_v41 = vadd.f32 %v1987_v24, %v1986_v43  ;;  %v2028_v29 = vsel %vm44_vm0, %v1955_v60, 0.0 }
 0x471   :  { %v2026_v1 = vsel %vm44_vm0, %v1954_v19, 0.0  ;;  %v2721_v58 = vpop.f32.mrb[32].mxu1 }
 0x472   :  { %v2027_v3 = vadd.f32 %v2026_v1, %v2025_v36  ;;  %v1935_v52 = vmul.f32 %v2721_v58, %v3202_v31  ;;  %v1581_v16 = vpop.f32.mrb[33].mxu1  ;;  %2804 = vmatprep.mubr.msk.f32.mxu1 %vm44_vm0, %v1988_v41 }
 0x473   :  { %v1934_v55 = vmul.f32 %v1581_v16, %v3219_v42 }
 0x474   :  { %v1990_v53 = vsel %vm44_vm0, %v1935_v52, 0.0  ;;  %v2029_v48 = vadd.f32 %v2028_v29, %v2027_v3 }
 0x475   :  { %v1989_v37 = vsel %vm44_vm0, %v1934_v55, 0.0 }
 0x476   :  { %v1991_v34 = vadd.f32 %v1990_v53, %v1989_v37 }
 0x47a   :  { %v2760_v2 = vpop.f32.mrb[36].mxu0 }
 0x47b   :  { %v1837_v62 = vpop.f32.mrb[37].mxu0  ;;  %v1957_v54 = vmul.f32 %v2760_v2, %v4236_v27 }
 0x47c   :  { %v1956_v20 = vmul.f32 %v1837_v62, %v4237_v26 }
 0x47d   :  { %v2032_v61 = vsel %vm44_vm0, %v1957_v54, 0.0 }
 0x47e   :  { %v2030_v11 = vsel %vm44_vm0, %v1956_v20, 0.0  ;;  %v2724_v39 = vpop.f32.mrb[34].mxu1 }
 0x47f   :  { %v2031_v10 = vadd.f32 %v2030_v11, %v2029_v48  ;;  %v1591_v35 = vpop.f32.mrb[35].mxu1  ;;  %v1937_v32 = vmul.f32 %v2724_v39, %v4232_v22 }
 0x480   :  { %v1936_v6 = vmul.f32 %v1591_v35, %v4233_v59 }
 0x481   :  { %v2033_v4 = vadd.f32 %v2032_v61, %v2031_v10  ;;  %v1994_v18 = vsel %vm44_vm0, %v1937_v32, 0.0 }
 0x482   :  { %v1992_v47 = vsel %vm44_vm0, %v1936_v6, 0.0  ;;  %v2763_v40 = vpop.f32.mrb[38].mxu0 }
 0x483   :  { %v1993_v14 = vadd.f32 %v1992_v47, %v1991_v34  ;;  %v1959_v30 = vmul.f32 %v2763_v40, %v3202_v31  ;;  %v1847_v0 = vpop.f32.mrb[39].mxu0  ;;  %2805 = vmatmul.mubr.msk.f32.vlgmr.msra.gmra.mrb[48].mxu1 %vm44_vm0, %v2033_v4 }
 0x484   :  { %v1958_v57 = vmul.f32 %v1847_v0, %v3219_v42  ;;  %2865 = vmatpush3.bf16.msra.mxu1 %v4075_v50 }
 0x485   :  { %v2035_v51 = vsel %vm44_vm0, %v1959_v30, 0.0  ;;  %v1995_v46 = vadd.f32 %v1994_v18, %v1993_v14  ;;  %2867 = vmatprep.subr.bf16.mxu1 %v2866_v5 }
 0x486   :  { %v2034_v25 = vsel %vm44_vm0, %v1958_v57, 0.0  ;;  %v2727_v15 = vpop.f32.mrb[36].mxu1 }
 0x487   :  { %v2036_v23 = vadd.f32 %v2035_v51, %v2034_v25  ;;  %v1601_v13 = vpop.f32.mrb[37].mxu1  ;;  %v1939_v12 = vmul.f32 %v2727_v15, %v4234_v33 }
 0x488   :  { %v1938_v38 = vmul.f32 %v1601_v13, %v4235_v21  ;;  %2869 = vmatpush3.bf16.msra.mxu1 %v2866_v5 }
 0x489   :  { %v1998_v50 = vsel %vm44_vm0, %v1939_v12, 0.0 }
 0x48a   :  { %v1996_v9 = vsel %vm44_vm0, %v1938_v38, 0.0  ;;  %v2766_v7 = vpop.f32.mrb[40].mxu0 }
 0x48b   :  { %v1997_v63 = vadd.f32 %v1996_v9, %v1995_v46  ;;  %v1857_v49 = vpop.f32.mrb[41].mxu0  ;;  %v1961_v28 = vmul.f32 %v2766_v7, %v4232_v22 }
 0x48c   :  { %v1960_v36 = vmul.f32 %v1857_v49, %v4233_v59 }
 0x48d   :  { %v1999_v45 = vadd.f32 %v1998_v50, %v1997_v63  ;;  %v2039_v60 = vsel %vm44_vm0, %v1961_v28, 0.0 }
 0x48e   :  { %v2037_v44 = vsel %vm44_vm0, %v1960_v36, 0.0  ;;  %v2730_v43 = vpop.f32.mrb[38].mxu1 }
 0x48f   :  { %v2038_v56 = vadd.f32 %v2037_v44, %v2036_v23  ;;  %v1611_v24 = vpop.f32.mrb[39].mxu1  ;;  %v1941_v19 = vmul.f32 %v2730_v43, %v4236_v27 }
 0x490   :  { %v1940_v41 = vmul.f32 %v1611_v24, %v4237_v26 }
 0x491   :  { %v2040_v1 = vadd.f32 %v2039_v60, %v2038_v56  ;;  %v2002_v53 = vsel %vm44_vm0, %v1941_v19, 0.0 }
 0x492   :  { %v2000_v58 = vsel %vm44_vm0, %v1940_v41, 0.0  ;;  %v2733_v3 = vpop.f32.mrb[40].mxu1 }
 0x493   :  { %v2001_v52 = vadd.f32 %v2000_v58, %v1999_v45  ;;  %v1943_v16 = vmul.f32 %v2733_v3, %v3202_v31  ;;  %v2769_v29 = vpop.f32.mrb[42].mxu0  ;;  %v1621_v55 = vpop.f32.mrb[41].mxu1 }
 0x494   :  { %v1942_v48 = vmul.f32 %v1621_v55, %v3219_v42  ;;  %v1867_v37 = vpop.f32.mrb[43].mxu0  ;;  %v1963_v62 = vmul.f32 %v2769_v29, %v4234_v33 }
 0x495   :  { %v2003_v34 = vadd.f32 %v2002_v53, %v2001_v52  ;;  %v2005_v2 = vsel %vm44_vm0, %v1943_v16, 0.0  ;;  %v1962_v54 = vmul.f32 %v1867_v37, %v4235_v21 }
 0x496   :  { %v2004_v20 = vsel %vm44_vm0, %v1942_v48, 0.0  ;;  %v2043_v35 = vsel %vm44_vm0, %v1963_v62, 0.0 }
 0x497   :  { %v2006_v11 = vadd.f32 %v2005_v2, %v2004_v20  ;;  %v2041_v39 = vsel %vm44_vm0, %v1962_v54, 0.0  ;;  %v2772_v17 = vpop.f32.mrb[44].mxu0  ;;  %2793 = vmatprep.mubr.msk.f32.mxu0 %vm44_vm0, %v2003_v34 }
 0x498   :  { %v2042_v8 = vadd.f32 %v2041_v39, %v2040_v1  ;;  %v1877_v10 = vpop.f32.mrb[45].mxu0  ;;  %v1965_v61 = vmul.f32 %v2772_v17, %v4236_v27 }
 0x499   :  { %v1964_v32 = vmul.f32 %v1877_v10, %v4237_v26 }
 0x49a   :  { %v2044_v6 = vadd.f32 %v2043_v35, %v2042_v8  ;;  %v2736_v4 = vpop.f32.mrb[42].mxu1  ;;  %v2047_v0 = vsel %vm44_vm0, %v1965_v61, 0.0 }
 0x49b   :  { %v2045_v5 = vsel %vm44_vm0, %v1964_v32, 0.0  ;;  %v1631_v47 = vpop.f32.mrb[43].mxu1  ;;  %v1945_v14 = vmul.f32 %v2736_v4, %v4232_v22  ;;  %v2463_v4 = vld [vmem:[%s4210_s6] ss:$0 sm:$0xff] }
 0x49c   :  { %v2046_v40 = vadd.f32 %v2045_v5, %v2044_v6  ;;  %v1944_v30 = vmul.f32 %v1631_v47, %v4233_v59 }
 0x49d   :  { %v2009_v23 = vsel %vm44_vm0, %v1945_v14, 0.0 }
 0x49e   :  { %v2048_v18 = vadd.f32 %v2047_v0, %v2046_v40  ;;  %v2007_v57 = vsel %vm44_vm0, %v1944_v30, 0.0  ;;  %v2775_v51 = vpop.f32.mrb[46].mxu0 }
 0x49f   :  { %v2008_v46 = vadd.f32 %v2007_v57, %v2006_v11  ;;  %v1967_v25 = vmul.f32 %v2775_v51, %v3202_v31  ;;  %v1887_v15 = vpop.f32.mrb[47].mxu0 }
 0x4a0   :  { %v1966_v13 = vmul.f32 %v1887_v15, %v3219_v42  ;;  %2794 = vmatmul.mubr.msk.f32.vlgmr.msra.gmra.mrb[54].mxu0 %vm44_vm0, %v2048_v18 }
 0x4a1   :  { %v2050_v12 = vsel %vm44_vm0, %v1967_v25, 0.0  ;;  %v2010_v38 = vadd.f32 %v2009_v23, %v2008_v46 }
 0x4a2   :  { %v2049_v9 = vsel %vm44_vm0, %v1966_v13, 0.0  ;;  %v2739_v7 = vpop.f32.mrb[44].mxu1 }
 0x4a3   :  { %v2051_v63 = vadd.f32 %v2050_v12, %v2049_v9  ;;  %v1641_v49 = vpop.f32.mrb[45].mxu1  ;;  %v1947_v50 = vmul.f32 %v2739_v7, %v4234_v33 }
 0x4a4   :  { %v1946_v28 = vmul.f32 %v1641_v49, %v4235_v21 }
 0x4a5   :  { %v2013_v42 = vsel %vm44_vm0, %v1947_v50, 0.0 }
 0x4a6   :  { %v2011_v31 = vsel %vm44_vm0, %v1946_v28, 0.0  ;;  %v2778_v36 = vpop.f32.mrb[48].mxu0 }
 0x4a7   :  { %v2012_v45 = vadd.f32 %v2011_v31, %v2010_v38  ;;  %v1897_v44 = vpop.f32.mrb[49].mxu0  ;;  %v1969_v43 = vmul.f32 %v2778_v36, %v4232_v22 }
 0x4a8   :  { %v1968_v56 = vmul.f32 %v1897_v44, %v4233_v59 }
 0x4a9   :  { %v2014_v24 = vadd.f32 %v2013_v42, %v2012_v45  ;;  %v2054_v58 = vsel %vm44_vm0, %v1969_v43, 0.0 }
 0x4aa   :  { %v2052_v60 = vsel %vm44_vm0, %v1968_v56, 0.0  ;;  %v2742_v19 = vpop.f32.mrb[46].mxu1 }
 0x4ab   :  { %v2053_v41 = vadd.f32 %v2052_v60, %v2051_v63  ;;  %v1651_v1 = vpop.f32.mrb[47].mxu1  ;;  %v1949_v3 = vmul.f32 %v2742_v19, %v4236_v27 }
 0x4ac   :  { %v1948_v52 = vmul.f32 %v1651_v1, %v4237_v26 }
 0x4ad   :  { %v2055_v16 = vadd.f32 %v2054_v58, %v2053_v41  ;;  %v2017_v59 = vsel %vm44_vm0, %v1949_v3, 0.0 }
 0x4ae   :  { %v2015_v29 = vsel %vm44_vm0, %v1948_v52, 0.0  ;;  %v2781_v55 = vpop.f32.mrb[50].mxu0 }
 0x4af   :  { %v2016_v53 = vadd.f32 %v2015_v29, %v2014_v24  ;;  %v1907_v22 = vpop.f32.mrb[51].mxu0  ;;  %v1971_v48 = vmul.f32 %v2781_v55, %v4234_v33 }
 0x4b0   :  { %v1970_v37 = vmul.f32 %v1907_v22, %v4235_v21 }
 0x4b1   :  { %v2018_v34 = vadd.f32 %v2017_v59, %v2016_v53  ;;  %v2058_v11 = vsel %vm44_vm0, %v1971_v48, 0.0 }
 0x4b2   :  { %v2056_v2 = vsel %vm44_vm0, %v1970_v37, 0.0  ;;  %v2784_v62 = vpop.f32.mrb[52].mxu0 }
 0x4b3   :  { %v2057_v54 = vadd.f32 %v2056_v2, %v2055_v16  ;;  %v1917_v20 = vpop.f32.mrb[53].mxu0  ;;  %2815 = vmatprep.mubr.msk.f32.mxu1 %vm44_vm0, %v2018_v34  ;;  %v1973_v39 = vmul.f32 %v2784_v62, %v4236_v27 }
 0x4b4   :  { %v1972_v17 = vmul.f32 %v1917_v20, %v4237_v26 }
 0x4b5   :  { %v2059_v8 = vadd.f32 %v2058_v11, %v2057_v54  ;;  %v2062_v21 = vsel %vm44_vm0, %v1973_v39, 0.0 }
 0x4b6   :  { %v2060_v10 = vsel %vm44_vm0, %v1972_v17, 0.0 }
 0x4b7   :  { %v2061_v33 = vadd.f32 %v2060_v10, %v2059_v8 }
 0x4b9   :  { %v2063_v35 = vadd.f32 %v2062_v21, %v2061_v33 }
 0x4bb   :  { %2816 = vmatmul.mubr.msk.f32.vlgmr.msra.gmra.mrb[48].mxu1 %vm44_vm0, %v2063_v35 }
 0x573   :  { %v2795_v61 = vpop.f32.mrb[54].mxu0 }
 0x574   :  { %v2148_v32 = vpop.f32.mrb[55].mxu0 }
 0x58e   :  { %v2817_v6 = vpop.f32.mrb[48].mxu1 }
 0x58f   :  { %v2870_v5 = vadd.f32 %v2817_v6, %v2795_v61  ;;  %v2310_v27 = vpop.f32.mrb[49].mxu1 }
 0x590   :  { %v2871_v26 = vadd.f32 %v2310_v27, %v2148_v32 }
 0x591   :  { %v2329_v47 = vadd.f32 %v2870_v5, %v2463_v4 }
 0x592   :  { %v2328_v40 = vadd.f32 %v2871_v26, %v2463_v4 }
 0x593   :  { %2331 = vst.msk [vmem:[#allocation2 + $0x8] sm:$0xff] %vm44_vm0, %v2329_v47 }
 0x594   :  { %2330 = vst.msk [vmem:[#allocation2] sm:$0xff] %vm44_vm0, %v2328_v40 }
 0x595   :  { %3104 = shalt.err (!%p3101_p4)
}
 0x596   :  { %s3105_s20 = scalar_lea.hbm %s4211_s7, 256 }
 0x597   :  { %p3106_p5 = scmp.ne.s32.totalorder %s4211_s7, %s3105_s20  ;;  %p3109_p6 = scmp.lt.u32.totalorder %s3105_s20, %s4211_s7 }
 0x599   :  { %p3111_p7 = pnand %p3109_p6, %p3106_p5 }
 0x59b   :  { %3114 = shalt.err (!%p3111_p7)
}
 0x59c   :  { %s3121_s22 = smov 128   ;;  %s3122_s23 = smov 8  }
 0x59d   :  { %2343 = dma.vmem_to_hbm [thread:$0]  %s2338_s18, 256, %s4211_s7, [#allocation3], %s3121_s22, %s3121_s22, %s3122_s23  }
 0x59e   :  { %3115 = dma.done.wait [#allocation3], 256  }
 0x59f   :  { %3116 = vsyncadd [#allocation3], 4294967040 }
 0x5a0   :  { %2347 = vsyncpa [#allocation3], 1 }

</bundles_post_ra>
